<compile_context>
chip_gen: v5e
topology: v5e:2x2
jax: 0.10.0
libtpu: 0.0.40
codegen_flags: <defaults>
</compile_context>

<pallas_src>
import functools

import jax
import jax.numpy as jnp
from jax.experimental import pallas as pl
from jax.experimental.pallas import tpu as pltpu


# ------------------------------ fused kernel ------------------------------- #

def _fused_forward_kernel(x_ref, w1_ref, w2_ref, gamma_ref, beta_ref, b2_ref,
                          o_ref, *,
                          N, S, W, W1, L1, Ly, Lz, Lm, HP, WP,
                          count, eps, slope):
    """Whole forward pass in one invocation.

    Layout: channels on sublanes, flattened spatial (row stride W) on lanes,
    batch folded onto lanes with per-image stride S (power of two).  Columns
    whose per-image position has ow >= W-2 (or lies in the inter-image gap)
    are 'junk': they never feed a valid output and are masked out of the BN
    statistics.
    """
    xv = x_ref[...]                                            # (C0p, N*S) f32

    # ---- conv1: 9 shifted taps stacked on (tile-aligned) sublanes, one MXU dot.
    taps1 = [xv[:, di * W + dj: di * W + dj + Ly]
             for di in range(3) for dj in range(3)]
    x_stack = jnp.concatenate(taps1, axis=0)                   # (9*C0p, Ly)
    y1 = jnp.dot(w1_ref[...], x_stack,
                 preferred_element_type=jnp.float32)           # (C1p, Ly)
    # NOTE: conv1 bias omitted on purpose - it is exactly cancelled by the
    # training-mode BatchNorm mean subtraction.

    # ---- BatchNorm (training-mode batch stats) + ReLU; mask built in-kernel.
    col = jax.lax.broadcasted_iota(jnp.int32, (1, Ly), 1)
    p = jnp.bitwise_and(col, S - 1)                            # per-image position
    valid = jnp.logical_and(p < L1, jnp.bitwise_and(col, W - 1) < W1)
    m = valid.astype(jnp.float32)                              # (1, Ly)
    y1m = y1 * m
    inv_count = 1.0 / count
    mean = jnp.sum(y1m, axis=1, keepdims=True) * inv_count     # (C1p, 1)
    var = jnp.maximum(
        jnp.sum(y1m * y1m, axis=1, keepdims=True) * inv_count - mean * mean, 0.0)
    scale = gamma_ref[...] * jax.lax.rsqrt(var + eps)          # fused BN scale/shift
    shift = beta_ref[...] - mean * scale
    h1 = jnp.maximum(y1 * scale + shift, 0.0)                  # (C1p, Ly); pad rows 0

    # ---- conv2 (+bias): same stacked-tap single dot, reading h1 directly
    # (no VMEM scratch round-trip - y1/h1 were computed wide enough).
    taps2 = [h1[:, dh * W + dw: dh * W + dw + Lz]
             for dh in range(3) for dw in range(3)]
    h_stack = jnp.concatenate(taps2, axis=0)                   # (9*C1p, Lz)
    y2 = jnp.dot(w2_ref[...], h_stack,
                 preferred_element_type=jnp.float32) + b2_ref[...]   # (C2, Lz)

    # ---- 2x2/2 max pool: elementwise max of 4 shifted slices, then pick the
    # pooled columns with a 0/1 selection matmul (no lane gathers).
    mt = jnp.maximum(jnp.maximum(y2[:, 0:Lm], y2[:, 1:1 + Lm]),
                     jnp.maximum(y2[:, W:W + Lm], y2[:, W + 1:W + 1 + Lm]))

    # Selection matrix generated in-kernel (no HBM constant).  Output column
    # q = n*HP*WP + i*WP + j picks pooled-max column n*S + 2*W*i + 2*j.
    # Digits of q extracted with comparison sums (no vector integer division).
    NP = N * HP * WP
    q = jax.lax.broadcasted_iota(jnp.int32, (1, NP), 1)
    nq = jnp.zeros_like(q)
    for k in range(1, N):
        nq = nq + (q >= k * HP * WP).astype(jnp.int32)
    qm = q - nq * (HP * WP)
    iq = jnp.zeros_like(q)
    for k in range(1, HP):
        iq = iq + (qm >= k * WP).astype(jnp.int32)
    jq = qm - iq * WP
    target = nq * S + iq * (2 * W) + jq * 2                    # (1, NP)
    rows = jax.lax.broadcasted_iota(jnp.int32, (Lm, NP), 0)
    sel = (rows == target).astype(jnp.float32)                 # (Lm, NP)

    out = jnp.dot(mt, sel, preferred_element_type=jnp.float32)  # (C2, NP)
    o_ref[...] = jnp.where(out > 0.0, out, slope * out)         # LeakyReLU(0.1)


# ------------------------------ JAX wrapper -------------------------------- #

def test_model_forward(x_nchw, params):
    """Forward pass of TestModel. Input (N, 3, H, W) -> output (N, 20, HP, WP)."""
    w1, b1, gamma, beta, w2, b2 = params
    del b1  # cancelled exactly by training-mode BatchNorm (see kernel note)

    N, C0, H, W = x_nchw.shape
    C1, C2 = w1.shape[0], w2.shape[0]
    H1, W1 = H - 2, W - 2          # conv1 output
    H2, W2 = H1 - 2, W1 - 2        # conv2 output
    HP, WP = H2 // 2, W2 // 2      # pooled output

    # Pad channel groups to f32 sublane-tile multiples so the in-kernel tap
    # stacking concatenates at aligned sublane offsets.
    C0p, C1p = 8, 16

    L1 = H1 * W                               # conv1 cols covering all valid outputs
    L2 = H2 * W                               # conv2 cols
    LM = 2 * W * (HP - 1) + 2 * (WP - 1) + 1  # per-image pooled-max window length
    # Per-image lane stride: power of two -> BN mask is pure bitwise math, and
    # big enough that every tap slice of the last image stays inside the slab.
    S = pl.next_power_of_2(max(H * W, L2 + 4 * W + 4))
    Ly = (N - 1) * S + L2 + 2 * W + 2         # conv1 cols incl. conv2 tap tail
    Lz = (N - 1) * S + L2
    Lm = (N - 1) * S + LM
    NP = N * HP * WP

    # Host-side layout prep (tiny): channels on sublanes, batch folded on lanes.
    xf = x_nchw.reshape(N, C0, H * W).astype(jnp.float32)
    xf = jnp.pad(xf, ((0, 0), (0, C0p - C0), (0, S - H * W)))
    x_slab = jnp.transpose(xf, (1, 0, 2)).reshape(C0p, N * S)

    w1f = jnp.pad(jnp.transpose(w1, (0, 2, 3, 1)),
                  ((0, C1p - C1), (0, 0), (0, 0), (0, C0p - C0))
                  ).reshape(C1p, 9 * C0p).astype(jnp.float32)
    w2f = jnp.pad(jnp.transpose(w2, (0, 2, 3, 1)),
                  ((0, 0), (0, 0), (0, 0), (0, C1p - C1))
                  ).reshape(C2, 9 * C1p).astype(jnp.float32)
    gamma_p = jnp.pad(gamma, (0, C1p - C1)).reshape(C1p, 1).astype(jnp.float32)
    beta_p = jnp.pad(beta, (0, C1p - C1)).reshape(C1p, 1).astype(jnp.float32)
    b2c = b2.reshape(C2, 1).astype(jnp.float32)

    kernel = functools.partial(
        _fused_forward_kernel,
        N=N, S=S, W=W, W1=W1, L1=L1, Ly=Ly, Lz=Lz, Lm=Lm, HP=HP, WP=WP,
        count=float(N * H1 * W1), eps=1e-5, slope=0.1)

    out = pl.pallas_call(
        kernel,
        out_shape=jax.ShapeDtypeStruct((C2, NP), jnp.float32),
        in_specs=[pl.BlockSpec(memory_space=pltpu.MemorySpace.VMEM)
                  for _ in range(6)],
        out_specs=pl.BlockSpec(memory_space=pltpu.MemorySpace.VMEM),
        compiler_params=pltpu.CompilerParams(
            vmem_limit_bytes=32 * 1024 * 1024),
    )(x_slab, w1f, w2f, gamma_p, beta_p, b2c)

    # (C2, N*HP*WP) lane-dense kernel output -> NCHW (layout plumbing only).
    return jnp.transpose(out.reshape(C2, N, HP, WP), (1, 0, 2, 3))


# ------------------------------ reference & init ---------------------------- #

def reference_forward(x, params):
    """Pure-JAX reference matching the PyTorch module in training mode."""
    w1, b1, gamma, beta, w2, b2 = params
    dn = ("NCHW", "OIHW", "NCHW")
    y = jax.lax.conv_general_dilated(x, w1, (1, 1), "VALID",
                                     dimension_numbers=dn,
                                     precision=jax.lax.Precision.HIGHEST)
    y = y + b1.reshape(1, -1, 1, 1)
    mean = jnp.mean(y, axis=(0, 2, 3), keepdims=True)
    var = jnp.var(y, axis=(0, 2, 3), keepdims=True)        # biased, as in BN
    y = (y - mean) * jax.lax.rsqrt(var + 1e-5)
    y = y * gamma.reshape(1, -1, 1, 1) + beta.reshape(1, -1, 1, 1)
    y = jnp.maximum(y, 0.0)
    y = jax.lax.conv_general_dilated(y, w2, (1, 1), "VALID",
                                     dimension_numbers=dn,
                                     precision=jax.lax.Precision.HIGHEST)
    y = y + b2.reshape(1, -1, 1, 1)
    y = jax.lax.reduce_window(y, -jnp.inf, jax.lax.max,
                              (1, 1, 2, 2), (1, 1, 2, 2), "VALID")
    return jnp.where(y > 0.0, y, 0.1 * y)


def init_params(key):
    k1, k2, k3, k4 = jax.random.split(key, 4)
    fan1 = 3 * 3 * 3
    w1 = jax.random.uniform(k1, (10, 3, 3, 3), jnp.float32,
                            -1.0 / jnp.sqrt(fan1), 1.0 / jnp.sqrt(fan1))
    b1 = jax.random.uniform(k2, (10,), jnp.float32,
                            -1.0 / jnp.sqrt(fan1), 1.0 / jnp.sqrt(fan1))
    gamma = jnp.ones((10,), jnp.float32)   # BatchNorm2d weight
    beta = jnp.zeros((10,), jnp.float32)   # BatchNorm2d bias
    fan2 = 10 * 3 * 3
    w2 = jax.random.uniform(k3, (20, 10, 3, 3), jnp.float32,
                            -1.0 / jnp.sqrt(fan2), 1.0 / jnp.sqrt(fan2))
    b2 = jax.random.uniform(k4, (20,), jnp.float32,
                            -1.0 / jnp.sqrt(fan2), 1.0 / jnp.sqrt(fan2))
    return (w1, b1, gamma, beta, w2, b2)


if __name__ == "__main__":
    key = jax.random.PRNGKey(0)
    kx, kp = jax.random.split(key)
    x = jax.random.normal(kx, (2, 3, 16, 16), jnp.float32)   # NCHW, like PyTorch
    params = init_params(kp)

    out = jax.jit(test_model_forward)(x, params)
    out = jax.block_until_ready(out)
    assert out.shape == (2, 20, 6, 6), out.shape

    ref = reference_forward(x, params)
    err = float(jnp.max(jnp.abs(out - ref)))
    assert err < 2e-2, f"max abs err vs reference: {err}"
    print("KERNEL_OK")
</pallas_src>

<mosaic_0001>
module attributes {stable_mosaic.version = 11 : i64} {
  func.func @_fused_forward_kernel(%arg0: memref<8x1024xf32, #tpu.memory_space<vmem>>, %arg1: memref<16x72xf32, #tpu.memory_space<vmem>>, %arg2: memref<20x144xf32, #tpu.memory_space<vmem>>, %arg3: memref<16x1xf32, #tpu.memory_space<vmem>>, %arg4: memref<16x1xf32, #tpu.memory_space<vmem>>, %arg5: memref<20x1xf32, #tpu.memory_space<vmem>>, %arg6: memref<20x72xf32, #tpu.memory_space<vmem>>) attributes {dimension_semantics = [], scalar_prefetch = 0 : i64, scratch_operands = 0 : i64, tpu.core_type = #tpu.core_type<tc>} {
    %c0 = arith.constant 0 : index
    %c0_0 = arith.constant 0 : index
    %0 = vector.load %arg0[%c0, %c0_0] : memref<8x1024xf32, #tpu.memory_space<vmem>>, vector<8x1024xf32>
    %1 = vector.extract_strided_slice %0 {offsets = [0, 0], sizes = [8, 738], strides = [1, 1]} : vector<8x1024xf32> to vector<8x738xf32>
    %2 = vector.extract_strided_slice %0 {offsets = [0, 1], sizes = [8, 738], strides = [1, 1]} : vector<8x1024xf32> to vector<8x738xf32>
    %3 = vector.extract_strided_slice %0 {offsets = [0, 2], sizes = [8, 738], strides = [1, 1]} : vector<8x1024xf32> to vector<8x738xf32>
    %4 = vector.extract_strided_slice %0 {offsets = [0, 16], sizes = [8, 738], strides = [1, 1]} : vector<8x1024xf32> to vector<8x738xf32>
    %5 = vector.extract_strided_slice %0 {offsets = [0, 17], sizes = [8, 738], strides = [1, 1]} : vector<8x1024xf32> to vector<8x738xf32>
    %6 = vector.extract_strided_slice %0 {offsets = [0, 18], sizes = [8, 738], strides = [1, 1]} : vector<8x1024xf32> to vector<8x738xf32>
    %7 = vector.extract_strided_slice %0 {offsets = [0, 32], sizes = [8, 738], strides = [1, 1]} : vector<8x1024xf32> to vector<8x738xf32>
    %8 = vector.extract_strided_slice %0 {offsets = [0, 33], sizes = [8, 738], strides = [1, 1]} : vector<8x1024xf32> to vector<8x738xf32>
    %9 = vector.extract_strided_slice %0 {offsets = [0, 34], sizes = [8, 738], strides = [1, 1]} : vector<8x1024xf32> to vector<8x738xf32>
    %10 = tpu.concatenate %1, %2, %3, %4, %5, %6, %7, %8, %9 in 0 : vector<8x738xf32>, vector<8x738xf32>, vector<8x738xf32>, vector<8x738xf32>, vector<8x738xf32>, vector<8x738xf32>, vector<8x738xf32>, vector<8x738xf32>, vector<8x738xf32> -> vector<72x738xf32>
    %c0_1 = arith.constant 0 : index
    %c0_2 = arith.constant 0 : index
    %11 = vector.load %arg1[%c0_1, %c0_2] : memref<16x72xf32, #tpu.memory_space<vmem>>, vector<16x72xf32>
    %cst = arith.constant dense<0.000000e+00> : vector<16x738xf32>
    %12 = tpu.matmul %11, %10, %cst {dimension_numbers = #tpu.dot_dimension_numbers<[1], [0], [0], [1], [0, 0, 1, 1], [], []>} : vector<16x72xf32>, vector<72x738xf32>, vector<16x738xf32> -> vector<16x738xf32>
    %13 = tpu.iota {dimensions = array<i32: 1>} : vector<1x738xi32>
    %c511_i32 = arith.constant 511 : i32
    %14 = vector.broadcast %c511_i32 : i32 to vector<1x738xi32>
    %15 = arith.andi %13, %14 : vector<1x738xi32>
    %c224_i32 = arith.constant 224 : i32
    %16 = vector.broadcast %c224_i32 : i32 to vector<1x738xi32>
    %17 = arith.cmpi slt, %15, %16 : vector<1x738xi32>
    %c15_i32 = arith.constant 15 : i32
    %18 = vector.broadcast %c15_i32 : i32 to vector<1x738xi32>
    %19 = arith.andi %13, %18 : vector<1x738xi32>
    %c14_i32 = arith.constant 14 : i32
    %20 = vector.broadcast %c14_i32 : i32 to vector<1x738xi32>
    %21 = arith.cmpi slt, %19, %20 : vector<1x738xi32>
    %22 = arith.andi %17, %21 : vector<1x738xi1>
    %23 = arith.extui %22 : vector<1x738xi1> to vector<1x738xi32>
    %24 = arith.sitofp %23 : vector<1x738xi32> to vector<1x738xf32>
    %25 = vector.broadcast %24 : vector<1x738xf32> to vector<16x738xf32>
    %26 = arith.mulf %12, %25 : vector<16x738xf32>
    %cst_3 = arith.constant dense<0.000000e+00> : vector<16xf32>
    %27 = vector.multi_reduction <add>, %26, %cst_3 [1] : vector<16x738xf32> to vector<16xf32>
    %28 = vector.shape_cast %27 : vector<16xf32> to vector<16x1xf32>
    %cst_4 = arith.constant 0.00255102036 : f32
    %29 = vector.broadcast %cst_4 : f32 to vector<16x1xf32>
    %30 = arith.mulf %28, %29 : vector<16x1xf32>
    %31 = arith.mulf %26, %26 : vector<16x738xf32>
    %cst_5 = arith.constant dense<0.000000e+00> : vector<16xf32>
    %32 = vector.multi_reduction <add>, %31, %cst_5 [1] : vector<16x738xf32> to vector<16xf32>
    %33 = vector.shape_cast %32 : vector<16xf32> to vector<16x1xf32>
    %cst_6 = arith.constant 0.00255102036 : f32
    %34 = vector.broadcast %cst_6 : f32 to vector<16x1xf32>
    %35 = arith.mulf %33, %34 : vector<16x1xf32>
    %36 = arith.mulf %30, %30 : vector<16x1xf32>
    %37 = arith.subf %35, %36 : vector<16x1xf32>
    %cst_7 = arith.constant 0.000000e+00 : f32
    %38 = vector.broadcast %cst_7 : f32 to vector<16x1xf32>
    %39 = arith.maximumf %37, %38 : vector<16x1xf32>
    %c0_8 = arith.constant 0 : index
    %c0_9 = arith.constant 0 : index
    %40 = vector.load %arg3[%c0_8, %c0_9] : memref<16x1xf32, #tpu.memory_space<vmem>>, vector<16x1xf32>
    %cst_10 = arith.constant 9.99999974E-6 : f32
    %41 = vector.broadcast %cst_10 : f32 to vector<16x1xf32>
    %42 = arith.addf %39, %41 : vector<16x1xf32>
    %43 = math.rsqrt %42 : vector<16x1xf32>
    %44 = arith.mulf %40, %43 : vector<16x1xf32>
    %c0_11 = arith.constant 0 : index
    %c0_12 = arith.constant 0 : index
    %45 = vector.load %arg4[%c0_11, %c0_12] : memref<16x1xf32, #tpu.memory_space<vmem>>, vector<16x1xf32>
    %46 = arith.mulf %30, %44 : vector<16x1xf32>
    %47 = arith.subf %45, %46 : vector<16x1xf32>
    %48 = vector.broadcast %44 : vector<16x1xf32> to vector<16x738xf32>
    %49 = arith.mulf %12, %48 : vector<16x738xf32>
    %50 = vector.broadcast %47 : vector<16x1xf32> to vector<16x738xf32>
    %51 = arith.addf %49, %50 : vector<16x738xf32>
    %cst_13 = arith.constant 0.000000e+00 : f32
    %52 = vector.broadcast %cst_13 : f32 to vector<16x738xf32>
    %53 = arith.maximumf %51, %52 : vector<16x738xf32>
    %54 = vector.extract_strided_slice %53 {offsets = [0, 0], sizes = [16, 704], strides = [1, 1]} : vector<16x738xf32> to vector<16x704xf32>
    %55 = vector.extract_strided_slice %53 {offsets = [0, 1], sizes = [16, 704], strides = [1, 1]} : vector<16x738xf32> to vector<16x704xf32>
    %56 = vector.extract_strided_slice %53 {offsets = [0, 2], sizes = [16, 704], strides = [1, 1]} : vector<16x738xf32> to vector<16x704xf32>
    %57 = vector.extract_strided_slice %53 {offsets = [0, 16], sizes = [16, 704], strides = [1, 1]} : vector<16x738xf32> to vector<16x704xf32>
    %58 = vector.extract_strided_slice %53 {offsets = [0, 17], sizes = [16, 704], strides = [1, 1]} : vector<16x738xf32> to vector<16x704xf32>
    %59 = vector.extract_strided_slice %53 {offsets = [0, 18], sizes = [16, 704], strides = [1, 1]} : vector<16x738xf32> to vector<16x704xf32>
    %60 = vector.extract_strided_slice %53 {offsets = [0, 32], sizes = [16, 704], strides = [1, 1]} : vector<16x738xf32> to vector<16x704xf32>
    %61 = vector.extract_strided_slice %53 {offsets = [0, 33], sizes = [16, 704], strides = [1, 1]} : vector<16x738xf32> to vector<16x704xf32>
    %62 = vector.extract_strided_slice %53 {offsets = [0, 34], sizes = [16, 704], strides = [1, 1]} : vector<16x738xf32> to vector<16x704xf32>
    %63 = tpu.concatenate %54, %55, %56, %57, %58, %59, %60, %61, %62 in 0 : vector<16x704xf32>, vector<16x704xf32>, vector<16x704xf32>, vector<16x704xf32>, vector<16x704xf32>, vector<16x704xf32>, vector<16x704xf32>, vector<16x704xf32>, vector<16x704xf32> -> vector<144x704xf32>
    %c0_14 = arith.constant 0 : index
    %c0_15 = arith.constant 0 : index
    %64 = vector.load %arg2[%c0_14, %c0_15] : memref<20x144xf32, #tpu.memory_space<vmem>>, vector<20x144xf32>
    %cst_16 = arith.constant dense<0.000000e+00> : vector<20x704xf32>
    %65 = tpu.matmul %64, %63, %cst_16 {dimension_numbers = #tpu.dot_dimension_numbers<[1], [0], [0], [1], [0, 0, 1, 1], [], []>} : vector<20x144xf32>, vector<144x704xf32>, vector<20x704xf32> -> vector<20x704xf32>
    %c0_17 = arith.constant 0 : index
    %c0_18 = arith.constant 0 : index
    %66 = vector.load %arg5[%c0_17, %c0_18] : memref<20x1xf32, #tpu.memory_space<vmem>>, vector<20x1xf32>
    %67 = vector.broadcast %66 : vector<20x1xf32> to vector<20x704xf32>
    %68 = arith.addf %65, %67 : vector<20x704xf32>
    %69 = vector.extract_strided_slice %68 {offsets = [0, 0], sizes = [20, 683], strides = [1, 1]} : vector<20x704xf32> to vector<20x683xf32>
    %70 = vector.extract_strided_slice %68 {offsets = [0, 1], sizes = [20, 683], strides = [1, 1]} : vector<20x704xf32> to vector<20x683xf32>
    %71 = arith.maximumf %69, %70 : vector<20x683xf32>
    %72 = vector.extract_strided_slice %68 {offsets = [0, 16], sizes = [20, 683], strides = [1, 1]} : vector<20x704xf32> to vector<20x683xf32>
    %73 = vector.extract_strided_slice %68 {offsets = [0, 17], sizes = [20, 683], strides = [1, 1]} : vector<20x704xf32> to vector<20x683xf32>
    %74 = arith.maximumf %72, %73 : vector<20x683xf32>
    %75 = arith.maximumf %71, %74 : vector<20x683xf32>
    %76 = tpu.iota {dimensions = array<i32: 1>} : vector<1x72xi32>
    %c0_i32 = arith.constant 0 : i32
    %77 = vector.broadcast %c0_i32 : i32 to vector<1x72xi32>
    %c36_i32 = arith.constant 36 : i32
    %78 = vector.broadcast %c36_i32 : i32 to vector<1x72xi32>
    %79 = arith.cmpi sge, %76, %78 : vector<1x72xi32>
    %80 = arith.extui %79 : vector<1x72xi1> to vector<1x72xi32>
    %81 = arith.addi %77, %80 : vector<1x72xi32>
    %c36_i32_19 = arith.constant 36 : i32
    %82 = vector.broadcast %c36_i32_19 : i32 to vector<1x72xi32>
    %83 = arith.muli %81, %82 : vector<1x72xi32>
    %84 = arith.subi %76, %83 : vector<1x72xi32>
    %c0_i32_20 = arith.constant 0 : i32
    %85 = vector.broadcast %c0_i32_20 : i32 to vector<1x72xi32>
    %c6_i32 = arith.constant 6 : i32
    %86 = vector.broadcast %c6_i32 : i32 to vector<1x72xi32>
    %87 = arith.cmpi sge, %84, %86 : vector<1x72xi32>
    %88 = arith.extui %87 : vector<1x72xi1> to vector<1x72xi32>
    %89 = arith.addi %85, %88 : vector<1x72xi32>
    %c12_i32 = arith.constant 12 : i32
    %90 = vector.broadcast %c12_i32 : i32 to vector<1x72xi32>
    %91 = arith.cmpi sge, %84, %90 : vector<1x72xi32>
    %92 = arith.extui %91 : vector<1x72xi1> to vector<1x72xi32>
    %93 = arith.addi %89, %92 : vector<1x72xi32>
    %c18_i32 = arith.constant 18 : i32
    %94 = vector.broadcast %c18_i32 : i32 to vector<1x72xi32>
    %95 = arith.cmpi sge, %84, %94 : vector<1x72xi32>
    %96 = arith.extui %95 : vector<1x72xi1> to vector<1x72xi32>
    %97 = arith.addi %93, %96 : vector<1x72xi32>
    %c24_i32 = arith.constant 24 : i32
    %98 = vector.broadcast %c24_i32 : i32 to vector<1x72xi32>
    %99 = arith.cmpi sge, %84, %98 : vector<1x72xi32>
    %100 = arith.extui %99 : vector<1x72xi1> to vector<1x72xi32>
    %101 = arith.addi %97, %100 : vector<1x72xi32>
    %c30_i32 = arith.constant 30 : i32
    %102 = vector.broadcast %c30_i32 : i32 to vector<1x72xi32>
    %103 = arith.cmpi sge, %84, %102 : vector<1x72xi32>
    %104 = arith.extui %103 : vector<1x72xi1> to vector<1x72xi32>
    %105 = arith.addi %101, %104 : vector<1x72xi32>
    %c6_i32_21 = arith.constant 6 : i32
    %106 = vector.broadcast %c6_i32_21 : i32 to vector<1x72xi32>
    %107 = arith.muli %105, %106 : vector<1x72xi32>
    %108 = arith.subi %84, %107 : vector<1x72xi32>
    %c512_i32 = arith.constant 512 : i32
    %109 = vector.broadcast %c512_i32 : i32 to vector<1x72xi32>
    %110 = arith.muli %81, %109 : vector<1x72xi32>
    %c32_i32 = arith.constant 32 : i32
    %111 = vector.broadcast %c32_i32 : i32 to vector<1x72xi32>
    %112 = arith.muli %105, %111 : vector<1x72xi32>
    %113 = arith.addi %110, %112 : vector<1x72xi32>
    %c2_i32 = arith.constant 2 : i32
    %114 = vector.broadcast %c2_i32 : i32 to vector<1x72xi32>
    %115 = arith.muli %108, %114 : vector<1x72xi32>
    %116 = arith.addi %113, %115 : vector<1x72xi32>
    %117 = tpu.iota {dimensions = array<i32: 0>} : vector<683x72xi32>
    %118 = vector.broadcast %116 : vector<1x72xi32> to vector<683x72xi32>
    %119 = arith.cmpi eq, %117, %118 : vector<683x72xi32>
    %120 = arith.extui %119 : vector<683x72xi1> to vector<683x72xi32>
    %121 = arith.sitofp %120 : vector<683x72xi32> to vector<683x72xf32>
    %cst_22 = arith.constant dense<0.000000e+00> : vector<20x72xf32>
    %122 = tpu.matmul %75, %121, %cst_22 {dimension_numbers = #tpu.dot_dimension_numbers<[1], [0], [0], [1], [0, 0, 1, 1], [], []>} : vector<20x683xf32>, vector<683x72xf32>, vector<20x72xf32> -> vector<20x72xf32>
    %cst_23 = arith.constant 0.000000e+00 : f32
    %123 = vector.broadcast %cst_23 : f32 to vector<20x72xf32>
    %124 = arith.cmpf ogt, %122, %123 : vector<20x72xf32>
    %cst_24 = arith.constant 1.000000e-01 : f32
    %125 = vector.broadcast %cst_24 : f32 to vector<20x72xf32>
    %126 = arith.mulf %125, %122 : vector<20x72xf32>
    %127 = arith.select %124, %122, %126 : vector<20x72xi1>, vector<20x72xf32>
    %c0_25 = arith.constant 0 : index
    %c0_26 = arith.constant 0 : index
    %128 = vector.load %arg6[%c0_25, %c0_26] : memref<20x72xf32, #tpu.memory_space<vmem>>, vector<20x72xf32>
    tpu.vector_store %arg6[%c0_25, %c0_26], %127 {strides = array<i32>} : memref<20x72xf32, #tpu.memory_space<vmem>>, vector<20x72xf32>,
    return
  }
}

</mosaic_0001>

<bundles_post_ra>
// kernel: test_model_forward.1
= control target key start
LH: loop header
LB: loop body
LE: loop exit
PB: predicated region body
PF: predicated region fallthrough
CT: control target
= control target key end

     0   :  { %s2716_s25 = smov 95   ;;  %s2717_s26 = smov 94   ;;  %vm225_vm0 = vcmask 769024   ;;  %vm198_vm1 = vcmask 777216   ;;  %vm171_vm2 = vcmask 785408   ;;  %vm120_vm3 = vcmask 908288   ;;  %s4188_s0 = inlined_call_operand.vmem [shape: f32[8,1024], index: 0, kind: input, shape index: {}]   ;;  %s4189_s1 = inlined_call_operand.vmem [shape: f32[16,72], index: 1, kind: input, shape index: {}]   ;;  %s4190_s3 = inlined_call_operand.vmem [shape: f32[16,1], index: 3, kind: input, shape index: {}]   ;;  %s4191_s4 = inlined_call_operand.vmem [shape: f32[16,1], index: 4, kind: input, shape index: {}]   ;;  %s4192_s5 = inlined_call_operand.vmem [shape: f32[20,1], index: 5, kind: input, shape index: {}]   ;;  %s4193_s2 = inlined_call_operand.vmem [shape: f32[20,144], index: 2, kind: input, shape index: {}]   ;;  %s4194_s6 = inlined_call_operand.vmem [shape: f32[20,72], index: 6, kind: output, shape index: {}]  }
   0x1   :  { %v2765_v0 = vld [vmem:[%s4188_s0] sm:$0xff]  ;;  %v2770_v1 = vld [vmem:[%s4188_s0 + $0x8] sm:$0xff]  ;;  %s2718_s27 = smov 96   ;;  %v2780_v3 = vld [vmem:[%s4188_s0 + $0x10] sm:$0xff]  ;;  %s2719_s8 = smov 110   ;;  %vm144_vm4 = vcmask 900096  }
   0x2   :  { %v2314_v2 = vpack.i.bf16 %v2770_v1, %v2765_v0  ;;  %v2785_v4 = vld [vmem:[%s4188_s0 + $0x18] sm:$0xff]  ;;  %s2720_s9 = smov 111   ;;  %v2798_v6 = vld [vmem:[%s4188_s0 + $0x20] sm:$0xff]  ;;  %v2803_v7 = vld [vmem:[%s4188_s0 + $0x28] sm:$0xff]  ;;  %s2721_s14 = smov 112   ;;  %vm96_vm5 = vcmask 916480  }
   0x3   :  { %v2319_v5 = vpack.i.bf16 %v2785_v4, %v2780_v3  ;;  %v2349_v8 = vpack.i.bf16 %v2803_v7, %v2798_v6  ;;  %s2722_s15 = smov 126   ;;  %s2723_s16 = smov 127   ;;  %v29_v9 = vld [vmem:[%s4188_s0 + $0x30] sm:$0xff]  ;;  %vm72_vm6 = vcmask 1031168   ;;  %vm48_vm7 = vcmask 1039360  }
   0x4   :  { %2315 = vrot.lane.b32.xlu1 %v2314_v2, %s2716_s25  ;;  %2305 = vrot.lane.b32.xlu0 %v2314_v2, %s2717_s26  ;;  %vm240_vm8 = vcmask 588800  }
   0x5   :  { %2325 = vrot.lane.b32.xlu2 %v2314_v2, %s2718_s27 }
   0xc   :  { %2320 = vrot.lane.b32.xlu1 %v2319_v5, %s2716_s25  ;;  %2310 = vrot.lane.b32.xlu0 %v2319_v5, %s2717_s26 }
   0xd   :  { %2330 = vrot.lane.b32.xlu2 %v2319_v5, %s2718_s27 }
  0x14   :  { %2340 = vrot.lane.b32.xlu1 %v2319_v5, %s2719_s8  ;;  %2335 = vrot.lane.b32.xlu0 %v2314_v2, %s2719_s8 }
  0x15   :  { %2345 = vrot.lane.b32.xlu2 %v2314_v2, %s2720_s9 }
  0x1c   :  { %2355 = vrot.lane.b32.xlu1 %v2319_v5, %s2720_s9  ;;  %2350 = vrot.lane.b32.xlu0 %v2349_v8, %s2717_s26 }
  0x1d   :  { %2360 = vrot.lane.b32.xlu2 %v2314_v2, %s2721_s14 }
  0x24   :  { %2370 = vrot.lane.b32.xlu1 %v2319_v5, %s2721_s14  ;;  %2365 = vrot.lane.b32.xlu0 %v2349_v8, %s2716_s25 }
  0x25   :  { %2375 = vrot.lane.b32.xlu2 %v2314_v2, %s2722_s15 }
  0x2c   :  { %2385 = vrot.lane.b32.xlu1 %v2319_v5, %s2722_s15  ;;  %2380 = vrot.lane.b32.xlu0 %v2349_v8, %s2718_s27 }
  0x2d   :  { %2390 = vrot.lane.b32.xlu2 %v2314_v2, %s2723_s16 }
  0x34   :  { %2395 = vrot.lane.b32.xlu1 %v2319_v5, %s2723_s16  ;;  %140 = vrot.lane.b32.xlu0 %v2798_v6, %s2719_s8 }
  0x35   :  { %116 = vrot.lane.b32.xlu2 %v2798_v6, %s2720_s9 }
  0x3c   :  { %92 = vrot.lane.b32.xlu1 %v2798_v6, %s2721_s14  ;;  %223 = vrot.lane.b32.xlu0 %v29_v9, %s2717_s26 }
  0x3d   :  { %196 = vrot.lane.b32.xlu2 %v29_v9, %s2716_s25 }
  0x44   :  { %169 = vrot.lane.b32.xlu1 %v29_v9, %s2718_s27  ;;  %68 = vrot.lane.b32.xlu0 %v2798_v6, %s2722_s15 }
  0x45   :  { %44 = vrot.lane.b32.xlu2 %v2798_v6, %s2723_s16 }
  0x4c   :  { %118 = vrot.lane.b32.xlu1 %v2803_v7, %s2720_s9  ;;  %142 = vrot.lane.b32.xlu0 %v2803_v7, %s2719_s8 }
  0x4d   :  { %94 = vrot.lane.b32.xlu2 %v2803_v7, %s2721_s14 }
  0x54   :  { %46 = vrot.lane.b32.xlu1 %v2803_v7, %s2723_s16  ;;  %70 = vrot.lane.b32.xlu0 %v2803_v7, %s2722_s15 }
  0x5f   :  { %v2326_v10 = vpop.permute.xlu2 %2325 }
  0x60   :  { %v2328_v13 = vunpack.i.h.bf16 %v2326_v10  ;;  %v2327_v14 = vunpack.i.l.bf16 %v2326_v10 }
  0x62   :  { %v172_v24 = vsel %vm171_vm2, %v2327_v14, %v2328_v13 }
  0x67   :  { %v2843_v11 = vpop.permute.xlu2 %2330 }
  0x68   :  { %v2333_v25 = vunpack.i.h.bf16 %v2843_v11  ;;  %v2332_v33 = vunpack.i.l.bf16 %v2843_v11 }
  0x6a   :  { %v174_v38 = vsel %vm171_vm2, %v2332_v33, %v2333_v25  ;;  %v173_v41 = vsel %vm171_vm2, %v2328_v13, %v2332_v33 }
  0x6f   :  { %v2845_v12 = vpop.permute.xlu2 %2345 }
  0x70   :  { %v2348_v39 = vunpack.i.h.bf16 %v2845_v12  ;;  %v2347_v40 = vunpack.i.l.bf16 %v2845_v12 }
  0x72   :  { %v121_v51 = vsel %vm120_vm3, %v2347_v40, %v2348_v39 }
  0x76   :  { %v2316_v15 = vpop.permute.xlu1 %2315  ;;  %v2306_v16 = vpop.permute.xlu0 %2305 }
  0x77   :  { %v2318_v17 = vunpack.i.h.bf16 %v2316_v15  ;;  %v2317_v18 = vunpack.i.l.bf16 %v2316_v15  ;;  %v2308_v19 = vunpack.i.h.bf16 %v2306_v16  ;;  %v2307_v20 = vunpack.i.l.bf16 %v2306_v16  ;;  %v2847_v21 = vpop.permute.xlu2 %2360 }
  0x78   :  { %v2363_v42 = vunpack.i.h.bf16 %v2847_v21  ;;  %v2362_v43 = vunpack.i.l.bf16 %v2847_v21  ;;  %v2915_v21 = vld [vmem:[%s4189_s1] sm:$0xff] }
  0x79   :  { %v226_v22 = vsel %vm225_vm0, %v2307_v20, %v2308_v19  ;;  %v199_v23 = vsel %vm198_vm1, %v2317_v18, %v2318_v17 }
  0x7a   :  { %254 = vmatpush.msra.mxu0 %v226_v22  ;;  %v97_v59 = vsel %vm96_vm5, %v2362_v43, %v2363_v42 }
  0x7c   :  { %255 = vmatpush.msra.mxu0 %v199_v23 }
  0x7e   :  { %v2853_v26 = vpop.permute.xlu1 %2320  ;;  %v2311_v27 = vpop.permute.xlu0 %2310  ;;  %256 = vmatpush.msra.mxu0 %v172_v24 }
  0x7f   :  { %v2323_v28 = vunpack.i.h.bf16 %v2853_v26  ;;  %v2322_v29 = vunpack.i.l.bf16 %v2853_v26  ;;  %v2313_v30 = vunpack.i.h.bf16 %v2311_v27  ;;  %v2312_v31 = vunpack.i.l.bf16 %v2311_v27  ;;  %v2857_v32 = vpop.permute.xlu2 %2375  ;;  %v2928_v26 = vld [vmem:[%s4189_s1 + $0x8] sm:$0xff] }
  0x80   :  { %v2378_v50 = vunpack.i.h.bf16 %v2857_v32  ;;  %v2377_v52 = vunpack.i.l.bf16 %v2857_v32 }
  0x81   :  { %v227_v34 = vsel %vm225_vm0, %v2308_v19, %v2312_v31  ;;  %v228_v35 = vsel %vm225_vm0, %v2312_v31, %v2313_v30  ;;  %v201_v36 = vsel %vm198_vm1, %v2322_v29, %v2323_v28  ;;  %v200_v37 = vsel %vm198_vm1, %v2318_v17, %v2322_v29 }
  0x82   :  { %277 = vmatpush.msra.mxu1 %v227_v34  ;;  %300 = vmatpush.msra.mxu2 %v228_v35  ;;  %v73_v60 = vsel %vm72_vm6, %v2377_v52, %v2378_v50 }
  0x84   :  { %278 = vmatpush.msra.mxu1 %v200_v37  ;;  %301 = vmatpush.msra.mxu2 %v201_v36 }
  0x86   :  { %v2874_v44 = vpop.permute.xlu1 %2340  ;;  %v2336_v45 = vpop.permute.xlu0 %2335  ;;  %279 = vmatpush.msra.mxu1 %v173_v41  ;;  %302 = vmatpush.msra.mxu2 %v174_v38 }
  0x87   :  { %v2343_v46 = vunpack.i.h.bf16 %v2874_v44  ;;  %v2342_v47 = vunpack.i.l.bf16 %v2874_v44  ;;  %v2338_v48 = vunpack.i.h.bf16 %v2336_v45  ;;  %v2337_v49 = vunpack.i.l.bf16 %v2336_v45  ;;  %v2886_v56 = vpop.permute.xlu2 %2390 }
  0x88   :  { %v2393_v57 = vunpack.i.h.bf16 %v2886_v56  ;;  %v2392_v58 = vunpack.i.l.bf16 %v2886_v56 }
  0x89   :  { %v145_v53 = vsel %vm144_vm4, %v2337_v49, %v2338_v48  ;;  %v146_v54 = vsel %vm144_vm4, %v2338_v48, %v2342_v47  ;;  %v147_v55 = vsel %vm144_vm4, %v2342_v47, %v2343_v46 }
  0x8a   :  { %257 = vmatpush.msra.mxu0 %v145_v53  ;;  %280 = vmatpush.msra.mxu1 %v146_v54  ;;  %v49_v8 = vsel %vm48_vm7, %v2392_v58, %v2393_v57 }
  0x8b   :  { %303 = vmatpush.msra.mxu2 %v147_v55 }
  0x8c   :  { %258 = vmatpush.msra.mxu0 %v121_v51 }
  0x8e   :  { %v2894_v61 = vpop.permute.xlu1 %2355  ;;  %v2896_v62 = vpop.permute.xlu0 %2350  ;;  %259 = vmatpush.msra.mxu0 %v97_v59 }
  0x8f   :  { %v2358_v63 = vunpack.i.h.bf16 %v2894_v61  ;;  %v2357_v2 = vunpack.i.l.bf16 %v2894_v61  ;;  %v2352_v5 = vunpack.i.l.bf16 %v2896_v62  ;;  %v2353_v9 = vunpack.i.h.bf16 %v2896_v62  ;;  %v117_v38 = vpop.permute.xlu2 %116 }
  0x90   :  { %260 = vmatpush.msra.mxu0 %v73_v60 }
  0x91   :  { %v122_v10 = vsel %vm120_vm3, %v2348_v39, %v2357_v2  ;;  %v229_v12 = vsel %vm225_vm0, %v2313_v30, %v2352_v5  ;;  %v123_v13 = vsel %vm120_vm3, %v2357_v2, %v2358_v63  ;;  %v230_v14 = vsel %vm225_vm0, %v2352_v5, %v2353_v9 }
  0x92   :  { %261 = vmatpush.msra.mxu0 %v49_v8  ;;  %281 = vmatpush.msra.mxu1 %v122_v10 }
  0x93   :  { %323 = vmatpush.msra.mxu3 %v229_v12  ;;  %304 = vmatpush.msra.mxu2 %v123_v13  ;;  %v4195_v13 = vmov 0.0  }
  0x94   :  { %262 = vmatpush.msra.mxu0 %v2765_v0 }
  0x95   :  { %2082 = vmatmul.msk.f32.vlgmr.msra.gmra.mxu0 %vm240_vm8, %v2915_v21 }
  0x96   :  { %346 = vmatpush.msrb.mxu0 %v230_v14  ;;  %v2371_v15 = vpop.permute.xlu1 %2370  ;;  %v2366_v16 = vpop.permute.xlu0 %2365 }
  0x97   :  { %v2373_v17 = vunpack.i.h.bf16 %v2371_v15  ;;  %v2372_v18 = vunpack.i.l.bf16 %v2371_v15  ;;  %v2368_v19 = vunpack.i.h.bf16 %v2366_v16  ;;  %v2367_v20 = vunpack.i.l.bf16 %v2366_v16  ;;  %v197_v45 = vpop.permute.xlu2 %196 }
  0x99   :  { %v98_v22 = vsel %vm96_vm5, %v2363_v42, %v2372_v18  ;;  %v202_v0 = vsel %vm198_vm1, %v2323_v28, %v2367_v20  ;;  %v203_v23 = vsel %vm198_vm1, %v2367_v20, %v2368_v19  ;;  %v99_v24 = vsel %vm96_vm5, %v2372_v18, %v2373_v17 }
  0x9a   :  { %282 = vmatpush.msra.mxu1 %v98_v22  ;;  %324 = vmatpush.msra.mxu3 %v202_v0  ;;  %v124_v42 = vsel %vm120_vm3, %v2358_v63, %v117_v38  ;;  %v4196_v63 = vlaneseq }
  0x9b   :  { %347 = vmatpush.msrb.mxu0 %v203_v23  ;;  %305 = vmatpush.msra.mxu2 %v99_v24 }
  0x9c   :  { %v2987_v2 = vand.u32 127, %v4196_v63 }
  0x9d   :  { %2083 = vmatmul.msk.f32.gmra.mxu0 %vm240_vm8, %v2928_v26 }
  0x9e   :  { %v2386_v27 = vpop.permute.xlu1 %2385  ;;  %v2381_v29 = vpop.permute.xlu0 %2380  ;;  %v404_v10 = vand.u32 15, %v2987_v2  ;;  %v391_v12 = vadd.s32 640, %v2987_v2  ;;  %v390_v15 = vadd.s32 512, %v2987_v2 }
  0x9f   :  { %v2388_v30 = vunpack.i.h.bf16 %v2386_v27  ;;  %v2387_v31 = vunpack.i.l.bf16 %v2386_v27  ;;  %v2383_v33 = vunpack.i.h.bf16 %v2381_v29  ;;  %v2382_v34 = vunpack.i.l.bf16 %v2381_v29 }
  0xa0   :  { %vm410_vm11 = vcmp.lt.s32.totalorder %v404_v10, 14  ;;  %v397_v16 = vand.u32 511, %v391_v12  ;;  %v408_v24 = vand.u32 15, %v390_v15 }
  0xa1   :  { %v74_v28 = vsel %vm72_vm6, %v2378_v50, %v2387_v31  ;;  %v175_v35 = vsel %vm171_vm2, %v2333_v25, %v2382_v34  ;;  %v176_v36 = vsel %vm171_vm2, %v2382_v34, %v2383_v33  ;;  %v75_v37 = vsel %vm72_vm6, %v2387_v31, %v2388_v30 }
  0xa2   :  { %283 = vmatpush.msra.mxu1 %v74_v28  ;;  %325 = vmatpush.msra.mxu3 %v175_v35  ;;  %v2094_v14 = vsel %vm410_vm11, 1.0, %v4195_v13  ;;  %vm403_vm13 = vcmp.lt.s32.totalorder %v397_v16, 224 }
  0xa3   :  { %348 = vmatpush.msrb.mxu0 %v176_v36  ;;  %306 = vmatpush.msra.mxu2 %v75_v37 }
  0xa6   :  { %v2396_v39 = vpop.permute.xlu1 %2395  ;;  %v141_v32 = vpop.permute.xlu0 %140 }
  0xa7   :  { %v2398_v40 = vunpack.i.h.bf16 %v2396_v39  ;;  %v2397_v41 = vunpack.i.l.bf16 %v2396_v39  ;;  %v148_v11 = vsel %vm144_vm4, %v2343_v46, %v141_v32 }
  0xa8   :  { %326 = vmatpush.msra.mxu3 %v148_v11 }
  0xa9   :  { %v50_v25 = vsel %vm48_vm7, %v2393_v57, %v2397_v41  ;;  %v51_v43 = vsel %vm48_vm7, %v2397_v41, %v2398_v40 }
  0xaa   :  { %284 = vmatpush.msra.mxu1 %v50_v25  ;;  %327 = vmatpush.msra.mxu3 %v124_v42 }
  0xab   :  { %307 = vmatpush.msra.mxu2 %v51_v43 }
  0xac   :  { %285 = vmatpush.msra.mxu1 %v2770_v1  ;;  %v204_v1 = vsel %vm198_vm1, %v2368_v19, %v197_v45 }
  0xad   :  { %308 = vmatpush.msra.mxu2 %v2780_v3  ;;  %2084 = vmatmul.msk.f32.vlgmr.msra.gmra.mxu1 %vm240_vm8, %v2915_v21  ;;  %v45_v3 = vpop.permute.xlu2 %44 }
  0xae   :  { %v93_v44 = vpop.permute.xlu1 %92  ;;  %v224_v46 = vpop.permute.xlu0 %223  ;;  %2086 = vmatmul.msk.f32.vlgmr.msra.gmra.mxu2 %vm240_vm8, %v2915_v21  ;;  %v52_v53 = vsel %vm48_vm7, %v2398_v40, %v45_v3 }
  0xaf   :  { %v100_v47 = vsel %vm96_vm5, %v2373_v17, %v93_v44  ;;  %v231_v48 = vsel %vm225_vm0, %v2353_v9, %v224_v46  ;;  %v409_v17 = vand.u32 15, %v391_v12 }
  0xb0   :  { %328 = vmatpush.msra.mxu3 %v100_v47  ;;  %369 = vmatpush.msrb.mxu1 %v231_v48 }
  0xb1   :  { %vm415_vm14 = vcmp.lt.s32.totalorder %v409_v17, 14 }
  0xb2   :  { %370 = vmatpush.msrb.mxu1 %v204_v1  ;;  %vm421_vm15 = vmand %vm403_vm13, %vm415_vm14 }
  0xb3   :  { %v2097_v34 = vsel %vm421_vm15, 1.0, %v4195_v13 }
  0xb5   :  { %2085 = vmatmul.msk.f32.gmra.mxu1 %vm240_vm8, %v2928_v26  ;;  %v95_v57 = vpop.permute.xlu2 %94 }
  0xb6   :  { %v170_v49 = vpop.permute.xlu1 %169  ;;  %v69_v50 = vpop.permute.xlu0 %68  ;;  %2087 = vmatmul.msk.f32.gmra.mxu2 %vm240_vm8, %v2928_v26  ;;  %v101_v59 = vsel %vm96_vm5, %v93_v44, %v95_v57 }
  0xb7   :  { %v76_v51 = vsel %vm72_vm6, %v2388_v30, %v69_v50  ;;  %v177_v52 = vsel %vm171_vm2, %v2383_v33, %v170_v49 }
  0xb8   :  { %329 = vmatpush.msra.mxu3 %v76_v51  ;;  %371 = vmatpush.msrb.mxu1 %v177_v52 }
  0xba   :  { %330 = vmatpush.msra.mxu3 %v52_v53 }
  0xbc   :  { %331 = vmatpush.msra.mxu3 %v2785_v4 }
  0xbd   :  { %2088 = vmatmul.msk.f32.vlgmr.msra.gmra.mxu3 %vm240_vm8, %v2915_v21 }
  0xbe   :  { %v119_v54 = vpop.permute.xlu1 %118  ;;  %v143_v55 = vpop.permute.xlu0 %142 }
  0xbf   :  { %372 = vmatpush.msrb.mxu1 %v143_v55  ;;  %v149_v56 = vsel %vm144_vm4, %v141_v32, %v143_v55  ;;  %v125_v58 = vsel %vm120_vm3, %v117_v38, %v119_v54 }
  0xc0   :  { %349 = vmatpush.msrb.mxu0 %v149_v56 }
  0xc1   :  { %373 = vmatpush.msrb.mxu1 %v119_v54 }
  0xc2   :  { %350 = vmatpush.msrb.mxu0 %v125_v58 }
  0xc3   :  { %374 = vmatpush.msrb.mxu1 %v95_v57 }
  0xc4   :  { %351 = vmatpush.msrb.mxu0 %v101_v59 }
  0xc5   :  { %2089 = vmatmul.msk.f32.gmra.mxu3 %vm240_vm8, %v2928_v26 }
  0xc6   :  { %v47_v4 = vpop.permute.xlu1 %46  ;;  %v71_v60 = vpop.permute.xlu0 %70 }
  0xc7   :  { %375 = vmatpush.msrb.mxu1 %v71_v60  ;;  %v77_v61 = vsel %vm72_vm6, %v69_v50, %v71_v60  ;;  %v53_v62 = vsel %vm48_vm7, %v45_v3, %v47_v4 }
  0xc8   :  { %352 = vmatpush.msrb.mxu0 %v77_v61 }
  0xc9   :  { %376 = vmatpush.msrb.mxu1 %v47_v4 }
  0xca   :  { %353 = vmatpush.msrb.mxu0 %v53_v62 }
  0xcb   :  { %377 = vmatpush.msrb.mxu1 %v2803_v7  ;;  %v387_v7 = vadd.s32 128, %v2987_v2 }
  0xcc   :  { %354 = vmatpush.msrb.mxu0 %v2798_v6  ;;  %2092 = vmatmul.msk.f32.vlgmr.msrb.gmra.mxu1 %vm240_vm8, %v2915_v21 }
  0xcd   :  { %2090 = vmatmul.msk.f32.vlgmr.msrb.gmra.mxu0 %vm240_vm8, %v2915_v21  ;;  %v393_v5 = vand.u32 511, %v387_v7  ;;  %v405_v6 = vand.u32 15, %v387_v7 }
  0xcf   :  { %vm399_vm9 = vcmp.lt.s32.totalorder %v393_v5, 224  ;;  %vm411_vm10 = vcmp.lt.s32.totalorder %v405_v6, 14 }
  0xd0   :  { %vm417_vm12 = vmand %vm399_vm9, %vm411_vm10  ;;  %vm414_vm9 = vcmp.lt.s32.totalorder %v408_v24, 14  ;;  %vm450_vm10 = vcmask 801792   ;;  %v4197_v24 = vmov 0  }
  0xd1   :  { %v2095_v18 = vsel %vm417_vm12, 1.0, %v4195_v13  ;;  %v2096_v28 = vsel %vm414_vm9, 1.0, %v4195_v13  ;;  %2401 = vset.pattern.permute.xlu1 %v4197_v24  ;;  %2399 = vset.pattern.permute.xlu0 %v4197_v24 }
  0xd2   :  { %2400 = vset.pattern.permute.xlu2 %v4197_v24 }
  0xd4   :  { %2093 = vmatmul.msk.f32.gmra.mxu1 %vm240_vm8, %v2928_v26 }
  0xd5   :  { %2091 = vmatmul.msk.f32.gmra.mxu0 %vm240_vm8, %v2928_v26 }
 0x112   :  { %v2992_v9 = vpop.f32.mrf.mxu0 }
 0x113   :  { %v434_v21 = vmul.f32 %v2094_v14, %v2992_v9 }
 0x115   :  { %v465_v46 = vmul.f32 %v434_v21, %v434_v21 }
 0x11a   :  { %v3006_v0 = vpop.f32.mrf.mxu0 }
 0x11b   :  { %v440_v30 = vmul.f32 %v2094_v14, %v3006_v0 }
 0x11d   :  { %v471_v37 = vmul.f32 %v440_v30, %v440_v30 }
 0x12a   :  { %v2990_v8 = vpop.f32.mrf.mxu1 }
 0x12b   :  { %v435_v23 = vmul.f32 %v2095_v18, %v2990_v8 }
 0x12d   :  { %v446_v27 = vadd.f32 %v435_v23, %v434_v21  ;;  %v466_v47 = vmul.f32 %v435_v23, %v435_v23 }
 0x12f   :  { %v477_v52 = vadd.f32 %v466_v47, %v465_v46 }
 0x131   :  { %v2999_v19 = vpop.f32.mrf.mxu2 }
 0x132   :  { %v3001_v20 = vpop.f32.mrf.mxu1  ;;  %v436_v29 = vmul.f32 0.0, %v2999_v19 }
 0x133   :  { %v441_v33 = vmul.f32 %v2095_v18, %v3001_v20 }
 0x134   :  { %v447_v35 = vadd.f32 %v446_v27, %v436_v29  ;;  %v467_v55 = vmul.f32 %v436_v29, %v436_v29 }
 0x135   :  { %v472_v41 = vmul.f32 %v441_v33, %v441_v33  ;;  %v455_v43 = vadd.f32 %v441_v33, %v440_v30 }
 0x136   :  { %v478_v6 = vadd.f32 %v477_v52, %v467_v55  ;;  %v502_v52 = vld [vmem:[%s4190_s3 + $0x8] sm:$0xff] }
 0x137   :  { %v485_v48 = vadd.f32 %v472_v41, %v471_v37 }
 0x139   :  { %v3014_v26 = vpop.f32.mrf.mxu2 }
 0x13a   :  { %v442_v11 = vmul.f32 0.0, %v3014_v26 }
 0x13c   :  { %v473_v1 = vmul.f32 %v442_v11, %v442_v11  ;;  %v456_v49 = vadd.f32 %v455_v43, %v442_v11 }
 0x13e   :  { %v486_v56 = vadd.f32 %v485_v48, %v473_v1 }
 0x140   :  { %v3004_v22 = vpop.f32.mrf.mxu3 }
 0x141   :  { %v437_v31 = vmul.f32 0.0, %v3004_v22 }
 0x143   :  { %v448_v40 = vadd.f32 %v447_v35, %v437_v31  ;;  %v468_v60 = vmul.f32 %v437_v31, %v437_v31 }
 0x145   :  { %v479_v17 = vadd.f32 %v478_v6, %v468_v60 }
 0x148   :  { %v3019_v38 = vpop.f32.mrf.mxu3 }
 0x149   :  { %v3017_v36 = vpop.f32.mrf.mxu1  ;;  %v443_v45 = vmul.f32 0.0, %v3019_v38 }
 0x14a   :  { %v3021_v39 = vpop.f32.mrf.mxu0  ;;  %v439_v32 = vmul.f32 %v2097_v34, %v3017_v36 }
 0x14b   :  { %v438_v25 = vmul.f32 %v2096_v28, %v3021_v39  ;;  %v474_v50 = vmul.f32 %v443_v45, %v443_v45  ;;  %v457_v57 = vadd.f32 %v456_v49, %v443_v45 }
 0x14c   :  { %v451_v42 = vsel %vm450_vm10, %v439_v32, 0.0  ;;  %v470_v15 = vmul.f32 %v439_v32, %v439_v32 }
 0x14d   :  { %v449_v44 = vadd.f32 %v448_v40, %v438_v25  ;;  %v487_v7 = vadd.f32 %v486_v56, %v474_v50  ;;  %v469_v10 = vmul.f32 %v438_v25, %v438_v25 }
 0x14e   :  { %v481_v21 = vsel %vm450_vm10, %v470_v15, 0.0 }
 0x14f   :  { %v452_v3 = vadd.f32 %v451_v42, %v449_v44  ;;  %v480_v18 = vadd.f32 %v479_v17, %v469_v10 }
 0x151   :  { %453 = vadd.xlane.f32.xlu0 %v452_v3  ;;  %v3028_v51 = vpop.f32.mrf.mxu1  ;;  %v482_v23 = vadd.f32 %v481_v21, %v480_v18 }
 0x152   :  { %v3030_v53 = vpop.f32.mrf.mxu0  ;;  %v445_v54 = vmul.f32 %v2097_v34, %v3028_v51 }
 0x153   :  { %v444_v58 = vmul.f32 %v2096_v28, %v3030_v53 }
 0x154   :  { %v476_v59 = vmul.f32 %v445_v54, %v445_v54  ;;  %v459_v4 = vsel %vm450_vm10, %v445_v54, 0.0 }
 0x155   :  { %v475_v61 = vmul.f32 %v444_v58, %v444_v58  ;;  %v458_v62 = vadd.f32 %v457_v57, %v444_v58  ;;  %v528_v58 = vld [vmem:[%s4191_s4 + $0x8] sm:$0xff] }
 0x156   :  { %v489_v5 = vsel %vm450_vm10, %v476_v59, 0.0  ;;  %vm993_vm10 = vcmask 130048  }
 0x157   :  { %v460_v12 = vadd.f32 %v459_v4, %v458_v62  ;;  %v488_v14 = vadd.f32 %v487_v7, %v475_v61  ;;  %v501_v4 = vld [vmem:[%s4190_s3] sm:$0xff] }
 0x159   :  { %461 = vadd.xlane.f32.xlu2 %v460_v12  ;;  %v490_v16 = vadd.f32 %v489_v5, %v488_v14  ;;  %v527_v5 = vld [vmem:[%s4191_s4] sm:$0xff] }
 0x15b   :  { %491 = vadd.xlane.f32.xlu1 %v490_v16 }
 0x161   :  { %483 = vadd.xlane.f32.xlu2 %v482_v23 }
 0x1c4   :  { %v454_v30 = vpop.xlane.xlu0 %453 }
 0x1c5   :  { %v463_v28 = vmul.f32 0.0025510204, %v454_v30 }
 0x1c7   :  { %v495_v40 = vmul.f32 %v463_v28, %v463_v28 }
 0x1cc   :  { %v462_v27 = vpop.xlane.xlu2 %461 }
 0x1cd   :  { %v464_v29 = vmul.f32 0.0025510204, %v462_v27 }
 0x1ce   :  { %v492_v31 = vpop.xlane.xlu1 %491 }
 0x1cf   :  { %v496_v33 = vmul.f32 %v464_v29, %v464_v29  ;;  %v494_v34 = vmul.f32 0.0025510204, %v492_v31 }
 0x1d1   :  { %v498_v35 = vsub.f32 %v494_v34, %v496_v33 }
 0x1d3   :  { %v500_v37 = vmax.f32 %v498_v35, 0.0 }
 0x1d4   :  { %v484_v32 = vpop.xlane.xlu2 %483 }
 0x1d5   :  { %v504_v41 = vadd.f32 1e-05, %v500_v37  ;;  %v493_v11 = vmul.f32 0.0025510204, %v484_v32 }
 0x1d7   :  { %2712 = vrsqrt.f32 %v504_v41  ;;  %v497_v25 = vsub.f32 %v493_v11, %v495_v40  ;;  %vm521_vm12 = vweird.f32 %v504_v41 }
 0x1d9   :  { %v499_v42 = vmax.f32 %v497_v25, 0.0 }
 0x1db   :  { %v503_v43 = vadd.f32 1e-05, %v499_v42 }
 0x1dd   :  { %v2713_v45 = vpop.eup %2712  ;;  %2714 = vrsqrt.f32 %v503_v43  ;;  %vm511_vm15 = vweird.f32 %v503_v43 }
 0x1de   :  { %v516_v44 = vmul.f32 %v2713_v45, %v504_v41  ;;  %vm522_vm11 = vweird.f32 %v2713_v45 }
 0x1df   :  { %vm523_vm13 = vmor %vm521_vm12, %vm522_vm11 }
 0x1e0   :  { %v517_v46 = vmul.f32 %v2713_v45, %v516_v44 }
 0x1e2   :  { %v518_v47 = vmul.f32 0.5, %v517_v46 }
 0x1e3   :  { %v2715_v48 = vpop.eup %2714 }
 0x1e4   :  { %v519_v1 = vsub.f32 1.5, %v518_v47  ;;  %v506_v3 = vmul.f32 %v2715_v48, %v503_v43  ;;  %vm512_vm14 = vweird.f32 %v2715_v48 }
 0x1e5   :  { %vm513_vm9 = vmor %vm511_vm15, %vm512_vm14 }
 0x1e6   :  { %v520_v49 = vmul.f32 %v2713_v45, %v519_v1  ;;  %v507_v50 = vmul.f32 %v2715_v48, %v506_v3 }
 0x1e8   :  { %v508_v54 = vmul.f32 0.5, %v507_v50  ;;  %v524_v55 = vsel %vm523_vm13, %v2713_v45, %v520_v49 }
 0x1e9   :  { %v526_v56 = vmul.f32 %v524_v55, %v502_v52 }
 0x1ea   :  { %v509_v57 = vsub.f32 1.5, %v508_v54 }
 0x1eb   :  { %v530_v59 = vmul.f32 %v526_v56, %v464_v29 }
 0x1ec   :  { %v510_v60 = vmul.f32 %v2715_v48, %v509_v57 }
 0x1ed   :  { %v532_v61 = vsub.f32 %v528_v58, %v530_v59 }
 0x1ee   :  { %v514_v62 = vsel %vm513_vm9, %v2715_v48, %v510_v60 }
 0x1ef   :  { %562 = vperm.xlu1 %2401, %v532_v61   ;;  %v525_v7 = vmul.f32 %v514_v62, %v501_v4 }
 0x1f1   :  { %535 = vperm.xlu0 %2399, %v525_v7   ;;  %v529_v6 = vmul.f32 %v525_v7, %v463_v28 }
 0x1f3   :  { %v531_v10 = vsub.f32 %v527_v5, %v529_v6 }
 0x1f5   :  { %557 = vperm.xlu2 %2400, %v531_v10  }
 0x1fd   :  { %540 = vperm.xlu2 %2400, %v526_v56  }
 0x24f   :  { %v3052_v12 = vpop.permute.xlu2 %557 }
 0x257   :  { %v3062_v18 = vpop.permute.xlu2 %540 }
 0x258   :  { %v551_v37 = vmul.f32 %v3062_v18, %v3014_v26  ;;  %v553_v42 = vmul.f32 %v3062_v18, %v3030_v53  ;;  %v552_v53 = vmul.f32 %v3062_v18, %v3019_v38  ;;  %v554_v52 = vmul.f32 %v3062_v18, %v3028_v51 }
 0x261   :  { %v3067_v29 = vpop.permute.xlu1 %562 }
 0x262   :  { %v573_v32 = vadd.f32 %v3067_v29, %v551_v37  ;;  %v3127_v45 = vadd.f32 %v3067_v29, %v553_v42  ;;  %v3145_v1 = vadd.f32 %v3067_v29, %v552_v53  ;;  %v3176_v55 = vadd.f32 %v3067_v29, %v554_v52 }
 0x263   :  { %v3054_v14 = vpop.permute.xlu0 %535 }
 0x264   :  { %v543_v15 = vmul.f32 %v3054_v14, %v2992_v9  ;;  %v544_v16 = vmul.f32 %v3054_v14, %v2990_v8  ;;  %v545_v17 = vmul.f32 %v3054_v14, %v2999_v19  ;;  %v549_v8 = vmul.f32 %v3062_v18, %v3006_v0 }
 0x265   :  { %v550_v9 = vmul.f32 %v3062_v18, %v3001_v20  ;;  %v3102_v11 = vmax.f32 %v573_v32, 0.0  ;;  %v547_v26 = vmul.f32 %v3054_v14, %v3021_v39  ;;  %v546_v44 = vmul.f32 %v3054_v14, %v3004_v22  ;;  %v975_v18 = vld [vmem:[%s4192_s5] sm:$0xff]  ;;  %v3259_v32 = vld [vmem:[%s4193_s2 + $0x18] sm:$0xff] }
 0x266   :  { %v565_v21 = vadd.f32 %v3052_v12, %v543_v15  ;;  %v566_v23 = vadd.f32 %v3052_v12, %v544_v16  ;;  %v567_v27 = vadd.f32 %v3052_v12, %v545_v17  ;;  %v571_v34 = vadd.f32 %v3067_v29, %v549_v8 }
 0x267   :  { %v572_v28 = vadd.f32 %v3067_v29, %v550_v9  ;;  %v3123_v43 = vadd.f32 %v3052_v12, %v547_v26  ;;  %v4202_v46 = vmax.f32 %v3127_v45, 0.0  ;;  %v3138_v47 = vadd.f32 %v3052_v12, %v546_v44  ;;  %v977_v29 = vld [vmem:[%s4192_s5 + $0x10] sm:$0xf]  ;;  %v3272_v26 = vld [vmem:[%s4193_s2 + $0x28] sm:$0xf] }
 0x268   :  { %v3069_v30 = vmax.f32 %v565_v21, 0.0  ;;  %v3071_v31 = vmax.f32 %v566_v23, 0.0  ;;  %v3077_v19 = vmax.f32 %v567_v27, 0.0  ;;  %v3088_v0 = vmax.f32 %v571_v34, 0.0  ;;  %v3246_v34 = vld [vmem:[%s4193_s2 + $0x8] sm:$0xff] }
 0x269   :  { %v3090_v20 = vmax.f32 %v572_v28, 0.0  ;;  %v4201_v39 = vmax.f32 %v3123_v43, 0.0  ;;  %v4203_v22 = vmax.f32 %v3138_v47, 0.0  ;;  %v4204_v38 = vmax.f32 %v3145_v1, 0.0 }
 0x26a   :  { %v2412_v33 = vpack.i.bf16 %v3071_v31, %v3069_v30  ;;  %v2407_v35 = vpack.i.bf16 %v3077_v19, %v3071_v31  ;;  %v2462_v40 = vpack.i.bf16 %v3069_v30, %v3088_v0  ;;  %v2542_v49 = vpack.i.bf16 %v3077_v19, %v3102_v11 }
 0x26b   :  { %v2452_v41 = vpack.i.bf16 %v3090_v20, %v3088_v0  ;;  %v2457_v25 = vpack.i.bf16 %v3102_v11, %v3090_v20  ;;  %v2527_v48 = vpack.i.bf16 %v4201_v39, %v4202_v46  ;;  %v2517_v3 = vpack.i.bf16 %v4203_v22, %v4204_v38 }
 0x26c   :  { %2413 = vrot.lane.b32.xlu1 %v2412_v33, %s2717_s26  ;;  %2408 = vrot.lane.b32.xlu0 %v2407_v35, %s2718_s27  ;;  %v548_v50 = vmul.f32 %v3054_v14, %v3017_v36  ;;  %v4200_v36 = vmax.f32 %v3176_v55, 0.0  ;;  %v976_v14 = vld [vmem:[%s4192_s5 + $0x8] sm:$0xff] }
 0x26d   :  { %2403 = vrot.lane.b32.xlu2 %v2407_v35, %s2716_s25 }
 0x26e   :  { %v3172_v54 = vadd.f32 %v3052_v12, %v548_v50 }
 0x270   :  { %v4199_v56 = vmax.f32 %v3172_v54, 0.0 }
 0x272   :  { %v2602_v51 = vpack.i.bf16 %v4199_v56, %v4200_v36 }
 0x274   :  { %2418 = vrot.lane.b32.xlu1 %v2407_v35, %s2719_s8  ;;  %2463 = vrot.lane.b32.xlu0 %v2462_v40, %s2716_s25 }
 0x275   :  { %2453 = vrot.lane.b32.xlu2 %v2452_v41, %s2717_s26 }
 0x27c   :  { %2423 = vrot.lane.b32.xlu1 %v2407_v35, %s2720_s9  ;;  %2473 = vrot.lane.b32.xlu0 %v2462_v40, %s2718_s27 }
 0x27d   :  { %2458 = vrot.lane.b32.xlu2 %v2457_v25, %s2719_s8 }
 0x284   :  { %2428 = vrot.lane.b32.xlu1 %v2407_v35, %s2721_s14  ;;  %2483 = vrot.lane.b32.xlu0 %v2462_v40, %s2719_s8 }
 0x285   :  { %2468 = vrot.lane.b32.xlu2 %v2457_v25, %s2720_s9 }
 0x28c   :  { %2433 = vrot.lane.b32.xlu1 %v2407_v35, %s2722_s15  ;;  %2493 = vrot.lane.b32.xlu0 %v2462_v40, %s2720_s9 }
 0x28d   :  { %2478 = vrot.lane.b32.xlu2 %v2457_v25, %s2721_s14 }
 0x294   :  { %2438 = vrot.lane.b32.xlu1 %v2407_v35, %s2723_s16  ;;  %2503 = vrot.lane.b32.xlu0 %v2462_v40, %s2721_s14 }
 0x295   :  { %2488 = vrot.lane.b32.xlu2 %v2457_v25, %s2722_s15 }
 0x29c   :  { %2443 = vrot.lane.b32.xlu1 %v2457_v25, %s2716_s25  ;;  %2513 = vrot.lane.b32.xlu0 %v2462_v40, %s2723_s16 }
 0x29d   :  { %2498 = vrot.lane.b32.xlu2 %v2457_v25, %s2723_s16 }
 0x2a4   :  { %2448 = vrot.lane.b32.xlu1 %v2457_v25, %s2718_s27  ;;  %2528 = vrot.lane.b32.xlu0 %v2527_v48, %s2716_s25 }
 0x2a5   :  { %2508 = vrot.lane.b32.xlu2 %v2462_v40, %s2722_s15 }
 0x2ac   :  { %2518 = vrot.lane.b32.xlu1 %v2517_v3, %s2716_s25  ;;  %2543 = vrot.lane.b32.xlu0 %v2542_v49, %s2717_s26 }
 0x2ad   :  { %2523 = vrot.lane.b32.xlu2 %v2517_v3, %s2718_s27 }
 0x2b4   :  { %2533 = vrot.lane.b32.xlu1 %v2517_v3, %s2719_s8  ;;  %2558 = vrot.lane.b32.xlu0 %v2517_v3, %s2721_s14 }
 0x2b5   :  { %2538 = vrot.lane.b32.xlu2 %v2527_v48, %s2718_s27 }
 0x2bc   :  { %2548 = vrot.lane.b32.xlu1 %v2517_v3, %s2720_s9  ;;  %2573 = vrot.lane.b32.xlu0 %v2527_v48, %s2721_s14 }
 0x2bd   :  { %2553 = vrot.lane.b32.xlu2 %v2527_v48, %s2719_s8 }
 0x2c4   :  { %2563 = vrot.lane.b32.xlu1 %v2527_v48, %s2720_s9  ;;  %2588 = vrot.lane.b32.xlu0 %v2527_v48, %s2722_s15 }
 0x2c5   :  { %2568 = vrot.lane.b32.xlu2 %v2517_v3, %s2722_s15 }
 0x2c7   :  { %v3181_v57 = vpop.permute.xlu2 %2403 }
 0x2c8   :  { %v4209_v42 = vunpack.i.h.bf16 %v3181_v57  ;;  %v2405_v44 = vunpack.i.l.bf16 %v3181_v57 }
 0x2cc   :  { %2578 = vrot.lane.b32.xlu1 %v2517_v3, %s2717_s26  ;;  %2603 = vrot.lane.b32.xlu0 %v2602_v51, %s2718_s27 }
 0x2cd   :  { %2583 = vrot.lane.b32.xlu2 %v2517_v3, %s2723_s16 }
 0x2cf   :  { %v3191_v58 = vpop.permute.xlu2 %2453 }
 0x2d0   :  { %v2456_v59 = vunpack.i.h.bf16 %v3191_v58  ;;  %v2455_v4 = vunpack.i.l.bf16 %v3191_v58 }
 0x2d2   :  { %v952_v60 = vsel %vm225_vm0, %v2455_v4, %v2456_v59 }
 0x2d3   :  { %1043 = vmatpush.msrb.mxu3 %v952_v60 }
 0x2d4   :  { %2593 = vrot.lane.b32.xlu1 %v2602_v51, %s2716_s25  ;;  %2618 = vrot.lane.b32.xlu0 %v2602_v51, %s2720_s9 }
 0x2d5   :  { %2598 = vrot.lane.b32.xlu2 %v2527_v48, %s2723_s16 }
 0x2d7   :  { %v3201_v61 = vpop.permute.xlu2 %2458 }
 0x2dc   :  { %2608 = vrot.lane.b32.xlu1 %v2527_v48, %s2717_s26  ;;  %2633 = vrot.lane.b32.xlu0 %v2602_v51, %s2723_s16 }
 0x2dd   :  { %2613 = vrot.lane.b32.xlu2 %v2602_v51, %s2719_s8 }
 0x2de   :  { %v3206_v62 = vpop.permute.xlu1 %2413  ;;  %v3208_v7 = vpop.permute.xlu0 %2408 }
 0x2df   :  { %v2416_v5 = vunpack.i.h.bf16 %v3206_v62  ;;  %v2415_v6 = vunpack.i.l.bf16 %v3206_v62  ;;  %v3212_v10 = vpop.permute.xlu2 %2468 }
 0x2e0   :  { %v4208_v13 = vunpack.i.h.bf16 %v3212_v10  ;;  %v2470_v63 = vunpack.i.l.bf16 %v3212_v10 }
 0x2e1   :  { %v947_v12 = vsel %vm225_vm0, %v2415_v6, %v2416_v5  ;;  %v902_v6 = vsel %vm198_vm1, %v2405_v44, %v4209_v42 }
 0x2e2   :  { %1044 = vmatpush.msrb.mxu3 %v947_v12  ;;  %v4205_v12 = vunpack.i.h.bf16 %v3208_v7 }
 0x2e3   :  { %2098 = vmatmul.msk.f32.vlgmr.msrb.gmra.mxu3 %vm993_vm10, %v3246_v34 }
 0x2e4   :  { %2623 = vrot.lane.b32.xlu1 %v2602_v51, %s2721_s14  ;;  %985 = vperm.xlu0 %2399, %v976_v14   ;;  %v2410_v14 = vunpack.i.l.bf16 %v3208_v7 }
 0x2e5   :  { %2628 = vrot.lane.b32.xlu2 %v2602_v51, %s2722_s15 }
 0x2e6   :  { %v3222_v15 = vpop.permute.xlu1 %2418  ;;  %v2464_v16 = vpop.permute.xlu0 %2463  ;;  %v856_v24 = vsel %vm171_vm2, %v2410_v14, %v4205_v12 }
 0x2e7   :  { %v3224_v17 = vpop.permute.xlu2 %2478  ;;  %v2466_v48 = vunpack.i.h.bf16 %v2464_v16  ;;  %v2465_v3 = vunpack.i.l.bf16 %v2464_v16  ;;  %v2421_v56 = vunpack.i.h.bf16 %v3222_v15  ;;  %v2420_v36 = vunpack.i.l.bf16 %v3222_v15 }
 0x2e8   :  { %v2480_v46 = vunpack.i.l.bf16 %v3224_v17 }
 0x2e9   :  { %v901_v60 = vsel %vm198_vm1, %v2466_v48, %v2405_v44  ;;  %v4206_v44 = vunpack.i.h.bf16 %v3201_v61 }
 0x2eb   :  { %2099 = vmatmul.msk.f32.gmra.mxu3 %vm993_vm10, %v3259_v32 }
 0x2ec   :  { %2638 = vrot.lane.b32.xlu1 %v2602_v51, %s2717_s26 }
 0x2ed   :  { %980 = vperm.xlu2 %2400, %v975_v18  }
 0x2ee   :  { %v3230_v21 = vpop.permute.xlu1 %2423  ;;  %v2474_v23 = vpop.permute.xlu0 %2473 }
 0x2ef   :  { %v3232_v27 = vpop.permute.xlu2 %2488  ;;  %v2476_v18 = vunpack.i.h.bf16 %v2474_v23  ;;  %v2426_v38 = vunpack.i.h.bf16 %v3230_v21 }
 0x2f0   :  { %v2490_v62 = vunpack.i.l.bf16 %v3232_v27 }
 0x2f1   :  { %v855_v39 = vsel %vm171_vm2, %v2476_v18, %v2410_v14 }
 0x2f3   :  { %2100 = vmatmul.msk.f32.gmra.mxu3 %vm993_vm10, %v3272_v26 }
 0x2f4   :  { %990 = vperm.xlu1 %2401, %v977_v29   ;;  %v2475_v29 = vunpack.i.l.bf16 %v2474_v23 }
 0x2f6   :  { %v3237_v8 = vpop.permute.xlu1 %2428  ;;  %v3239_v9 = vpop.permute.xlu0 %2483 }
 0x2f7   :  { %v3241_v33 = vpop.permute.xlu2 %2498 }
 0x2fe   :  { %v3250_v28 = vpop.permute.xlu1 %2433  ;;  %v3252_v35 = vpop.permute.xlu0 %2493 }
 0x2ff   :  { %v3254_v37 = vpop.permute.xlu2 %2508 }
 0x306   :  { %v3261_v40 = vpop.permute.xlu1 %2438  ;;  %v3265_v41 = vpop.permute.xlu0 %2503 }
 0x307   :  { %v3267_v25 = vpop.permute.xlu2 %2523 }
 0x308   :  { %v2525_v58 = vunpack.i.l.bf16 %v3267_v25 }
 0x30e   :  { %v3276_v53 = vpop.permute.xlu1 %2443  ;;  %v3282_v52 = vpop.permute.xlu0 %2513 }
 0x30f   :  { %v2446_v49 = vunpack.i.h.bf16 %v3276_v53  ;;  %v2445_v50 = vunpack.i.l.bf16 %v3276_v53  ;;  %v2510_v53 = vunpack.i.l.bf16 %v3254_v37 }
 0x311   :  { %v906_v51 = vsel %vm198_vm1, %v2465_v3, %v2445_v50  ;;  %v907_v4 = vsel %vm198_vm1, %v2445_v50, %v2446_v49  ;;  %v3296_v3 = vpop.permute.xlu2 %2538 }
 0x312   :  { %1003 = vmatpush.msrb.mxu2 %v906_v51  ;;  %1055 = vmatpush.msra.mxu3 %v907_v4  ;;  %v2460_v4 = vunpack.i.l.bf16 %v3201_v61 }
 0x314   :  { %1004 = vmatpush.msrb.mxu2 %v901_v60  ;;  %1056 = vmatpush.msra.mxu3 %v902_v6  ;;  %v2485_v60 = vunpack.i.l.bf16 %v3239_v9  ;;  %v815_v22 = vsel %vm144_vm4, %v2460_v4, %v4206_v44 }
 0x316   :  { %v3294_v16 = vpop.permute.xlu1 %2448  ;;  %v3300_v51 = vpop.permute.xlu0 %2528 }
 0x317   :  { %v4207_v50 = vunpack.i.h.bf16 %v3294_v16  ;;  %v2450_v48 = vunpack.i.l.bf16 %v3294_v16 }
 0x319   :  { %v860_v6 = vsel %vm171_vm2, %v2475_v29, %v2450_v48  ;;  %v861_v23 = vsel %vm171_vm2, %v2450_v48, %v4207_v50  ;;  %v2486_v29 = vunpack.i.h.bf16 %v3239_v9  ;;  %v2481_v48 = vunpack.i.h.bf16 %v3224_v17 }
 0x31a   :  { %1005 = vmatpush.msrb.mxu2 %v860_v6  ;;  %1057 = vmatpush.msra.mxu3 %v861_v23  ;;  %v2495_v6 = vunpack.i.l.bf16 %v3252_v35  ;;  %v814_v23 = vsel %vm144_vm4, %v2485_v60, %v2460_v4  ;;  %v2425_v9 = vunpack.i.l.bf16 %v3230_v21  ;;  %v810_v4 = vsel %vm144_vm4, %v2420_v36, %v2421_v56 }
 0x31b   :  { %v809_v60 = vsel %vm144_vm4, %v2486_v29, %v2420_v36  ;;  %v3344_v29 = vpop.permute.xlu2 %2553 }
 0x31c   :  { %1006 = vmatpush.msrb.mxu2 %v855_v39  ;;  %1058 = vmatpush.msra.mxu3 %v856_v24  ;;  %v769_v39 = vsel %vm120_vm3, %v2470_v63, %v4208_v13  ;;  %v2496_v24 = vunpack.i.h.bf16 %v3252_v35  ;;  %v723_v35 = vsel %vm96_vm5, %v2480_v46, %v2481_v48  ;;  %v2505_v13 = vunpack.i.l.bf16 %v3265_v41 }
 0x31d   :  { %v768_v42 = vsel %vm120_vm3, %v2495_v6, %v2470_v63  ;;  %v764_v63 = vsel %vm120_vm3, %v2425_v9, %v2426_v38  ;;  %v2530_v6 = vunpack.i.l.bf16 %v3300_v51 }
 0x31e   :  { %v2519_v12 = vpop.permute.xlu1 %2518  ;;  %1007 = vmatpush.msrb.mxu2 %v814_v23  ;;  %1059 = vmatpush.msra.mxu3 %v815_v22  ;;  %v3331_v18 = vpop.permute.xlu0 %2543  ;;  %v2491_v23 = vunpack.i.h.bf16 %v3232_v27 }
 0x31f   :  { %v2520_v14 = vunpack.i.l.bf16 %v2519_v12  ;;  %v2521_v44 = vunpack.i.h.bf16 %v2519_v12  ;;  %v2546_v50 = vunpack.i.h.bf16 %v3331_v18  ;;  %v4210_v22 = vunpack.i.l.bf16 %v3331_v18 }
 0x320   :  { %1008 = vmatpush.msrb.mxu2 %v809_v60  ;;  %1060 = vmatpush.msra.mxu3 %v810_v4  ;;  %v2431_v12 = vunpack.i.h.bf16 %v3237_v8  ;;  %v2430_v60 = vunpack.i.l.bf16 %v3237_v8  ;;  %v3494_v8 = vld [vmem:[%s4193_s2 + $0x10] sm:$0xff] }
 0x321   :  { %v908_v36 = vsel %vm198_vm1, %v2446_v49, %v2520_v14  ;;  %v953_v4 = vsel %vm225_vm0, %v2456_v59, %v4210_v22  ;;  %v2506_v49 = vunpack.i.h.bf16 %v3265_v41  ;;  %v948_v59 = vsel %vm225_vm0, %v2416_v5, %v2546_v50 }
 0x322   :  { %1009 = vmatpush.msrb.mxu2 %v768_v42  ;;  %1061 = vmatpush.msra.mxu3 %v769_v39  ;;  %v763_v42 = vsel %vm120_vm3, %v2496_v24, %v2425_v9  ;;  %v2526_v39 = vunpack.i.h.bf16 %v3267_v25  ;;  %v4211_v41 = vunpack.i.h.bf16 %v3181_v57  ;;  %v2531_v9 = vunpack.i.h.bf16 %v3300_v51 }
 0x323   :  { %1095 = vmatpush.msra.mxu0 %v953_v4  ;;  %1107 = vmatpush.msra.mxu1 %v908_v36  ;;  %v2540_v36 = vunpack.i.l.bf16 %v3296_v3  ;;  %v909_v25 = vsel %vm198_vm1, %v2520_v14, %v2530_v6  ;;  %v722_v24 = vsel %vm96_vm5, %v2505_v13, %v2480_v46  ;;  %v2435_v5 = vunpack.i.l.bf16 %v3250_v28 }
 0x324   :  { %1010 = vmatpush.msrb.mxu2 %v763_v42  ;;  %1062 = vmatpush.msra.mxu3 %v764_v63  ;;  %v903_v22 = vsel %vm198_vm1, %v4211_v41, %v2521_v44  ;;  %v2511_v57 = vunpack.i.h.bf16 %v3254_v37  ;;  %v4212_v63 = vunpack.i.h.bf16 %v3294_v16  ;;  %v904_v13 = vsel %vm198_vm1, %v2521_v44, %v2531_v9 }
 0x325   :  { %1096 = vmatpush.msra.mxu0 %v948_v59  ;;  %1108 = vmatpush.msra.mxu1 %v903_v22  ;;  %v2541_v22 = vunpack.i.h.bf16 %v3296_v3  ;;  %v717_v46 = vsel %vm96_vm5, %v2506_v49, %v2430_v60  ;;  %v2436_v37 = vunpack.i.h.bf16 %v3250_v28  ;;  %v718_v16 = vsel %vm96_vm5, %v2430_v60, %v2431_v12 }
 0x326   :  { %v2534_v4 = vpop.permute.xlu1 %2533  ;;  %1011 = vmatpush.msrb.mxu2 %v722_v24  ;;  %v862_v42 = vsel %vm171_vm2, %v4212_v63, %v2525_v58  ;;  %v3387_v41 = vpop.permute.xlu0 %2558  ;;  %1063 = vmatpush.msra.mxu3 %v723_v35  ;;  %v2515_v24 = vunpack.i.l.bf16 %v3282_v52  ;;  %v863_v44 = vsel %vm171_vm2, %v2525_v58, %v2540_v36  ;;  %v676_v49 = vsel %vm72_vm6, %v2510_v53, %v2490_v62 }
 0x327   :  { %1159 = vmatpush.msrb.mxu0 %v909_v25  ;;  %v2535_v59 = vunpack.i.l.bf16 %v2534_v4  ;;  %1109 = vmatpush.msra.mxu1 %v862_v42  ;;  %v2536_v14 = vunpack.i.h.bf16 %v2534_v4  ;;  %v4213_v25 = vunpack.i.h.bf16 %v3208_v7  ;;  %v4214_v4 = vunpack.i.h.bf16 %v3201_v61 }
 0x328   :  { %1012 = vmatpush.msrb.mxu2 %v717_v46  ;;  %1064 = vmatpush.msra.mxu3 %v718_v16  ;;  %v2501_v60 = vunpack.i.h.bf16 %v3241_v33  ;;  %v2500_v7 = vunpack.i.l.bf16 %v3241_v33  ;;  %v677_v42 = vsel %vm72_vm6, %v2490_v62, %v2491_v23  ;;  %v2555_v58 = vunpack.i.l.bf16 %v3344_v29  ;;  %v3415_v46 = vpop.permute.xlu2 %2568 }
 0x329   :  { %1160 = vmatpush.msrb.mxu0 %v904_v13  ;;  %v857_v35 = vsel %vm171_vm2, %v4213_v25, %v2526_v39  ;;  %v816_v63 = vsel %vm144_vm4, %v4214_v4, %v2535_v59  ;;  %v2516_v13 = vunpack.i.h.bf16 %v3282_v52  ;;  %v858_v61 = vsel %vm171_vm2, %v2526_v39, %v2541_v22 }
 0x32a   :  { %1110 = vmatpush.msra.mxu1 %v857_v35  ;;  %1013 = vmatpush.msrb.mxu2 %v676_v49  ;;  %v671_v53 = vsel %vm72_vm6, %v2511_v57, %v2435_v5  ;;  %v2441_v16 = vunpack.i.h.bf16 %v3261_v40  ;;  %v2440_v25 = vunpack.i.l.bf16 %v3261_v40  ;;  %v672_v52 = vsel %vm72_vm6, %v2435_v5, %v2436_v37 }
 0x32b   :  { %1161 = vmatpush.msrb.mxu0 %v863_v44  ;;  %1065 = vmatpush.msra.mxu3 %v677_v42  ;;  %v811_v62 = vsel %vm144_vm4, %v2421_v56, %v2536_v14  ;;  %v2556_v35 = vunpack.i.h.bf16 %v3344_v29  ;;  %v817_v39 = vsel %vm144_vm4, %v2535_v59, %v2555_v58  ;;  %v630_v57 = vsel %vm48_vm7, %v2515_v24, %v2500_v7  ;;  %v3456_v42 = vld [vmem:[%s4193_s2] sm:$0xff] }
 0x32c   :  { %1111 = vmatpush.msra.mxu1 %v816_v63  ;;  %1014 = vmatpush.msrb.mxu2 %v671_v53  ;;  %v631_v5 = vsel %vm48_vm7, %v2500_v7, %v2501_v60  ;;  %v625_v4 = vsel %vm48_vm7, %v2516_v13, %v2440_v25  ;;  %v626_v59 = vsel %vm48_vm7, %v2440_v25, %v2441_v16  ;;  %v2560_v24 = vunpack.i.l.bf16 %v3387_v41 }
 0x32d   :  { %1162 = vmatpush.msrb.mxu0 %v858_v61  ;;  %1066 = vmatpush.msra.mxu3 %v672_v52  ;;  %v812_v56 = vsel %vm144_vm4, %v2536_v14, %v2556_v35  ;;  %v4215_v7 = vunpack.i.h.bf16 %v3212_v10  ;;  %v2561_v13 = vunpack.i.h.bf16 %v3387_v41  ;;  %v2570_v10 = vunpack.i.l.bf16 %v3415_v46 }
 0x32e   :  { %1112 = vmatpush.msra.mxu1 %v811_v62  ;;  %v2549_v44 = vpop.permute.xlu1 %2548  ;;  %1015 = vmatpush.msrb.mxu2 %v630_v57  ;;  %v3447_v63 = vpop.permute.xlu0 %2573  ;;  %v724_v41 = vsel %vm96_vm5, %v2481_v48, %v2560_v24 }
 0x32f   :  { %1163 = vmatpush.msrb.mxu0 %v817_v39  ;;  %v2551_v15 = vunpack.i.h.bf16 %v2549_v44  ;;  %v2550_v49 = vunpack.i.l.bf16 %v2549_v44  ;;  %1067 = vmatpush.msra.mxu3 %v631_v5  ;;  %v678_v48 = vsel %vm72_vm6, %v2491_v23, %v2570_v10  ;;  %v2575_v53 = vunpack.i.l.bf16 %v3447_v63 }
 0x330   :  { %2101 = vmatmul.msk.f32.vlgmr.msra.gmra.mxu0 %vm993_vm10, %v3246_v34  ;;  %1016 = vmatpush.msrb.mxu2 %v625_v4  ;;  %v2576_v52 = vunpack.i.h.bf16 %v3447_v63 }
 0x331   :  { %1164 = vmatpush.msrb.mxu0 %v812_v56  ;;  %1068 = vmatpush.msra.mxu3 %v626_v59  ;;  %v770_v14 = vsel %vm120_vm3, %v4215_v7, %v2550_v49  ;;  %v765_v61 = vsel %vm120_vm3, %v2426_v38, %v2551_v15  ;;  %v3546_v59 = vld [vmem:[%s4193_s2 + $0x20] sm:$0xf] }
 0x332   :  { %1017 = vmatpush.msrb.mxu2 %v3088_v0  ;;  %1113 = vmatpush.msra.mxu1 %v770_v14  ;;  %v3465_v0 = vpop.permute.xlu2 %2583 }
 0x333   :  { %1069 = vmatpush.msra.mxu3 %v3090_v20  ;;  %v2585_v17 = vunpack.i.l.bf16 %v3465_v0 }
 0x334   :  { %1018 = vmatpush.msrb.mxu2 %v3069_v30  ;;  %1114 = vmatpush.msra.mxu1 %v765_v61  ;;  %v2571_v30 = vunpack.i.h.bf16 %v3415_v46 }
 0x335   :  { %1070 = vmatpush.msra.mxu3 %v3071_v31  ;;  %1019 = vmatmul.f32.vlgmr.msrb.gmra.mxu2 %v3456_v42  ;;  %v719_v31 = vsel %vm96_vm5, %v2431_v12, %v2561_v13  ;;  %v2586_v12 = vunpack.i.h.bf16 %v3465_v0  ;;  %v632_v62 = vsel %vm48_vm7, %v2501_v60, %v2585_v17  ;;  %v4217_v0 = vmax.f32 %v3145_v1, 0.0 }
 0x336   :  { %1071 = vmatmul.f32.vlgmr.msra.gmra.mxu3 %v3456_v42  ;;  %v3473_v20 = vpop.permute.xlu1 %2563  ;;  %1115 = vmatpush.msra.mxu1 %v724_v41  ;;  %v3497_v25 = vpop.permute.xlu0 %2588  ;;  %v673_v27 = vsel %vm72_vm6, %v2436_v37, %v2571_v30  ;;  %v725_v37 = vsel %vm96_vm5, %v2560_v24, %v2575_v53 }
 0x337   :  { %v2566_v38 = vunpack.i.h.bf16 %v3473_v20  ;;  %v2565_v21 = vunpack.i.l.bf16 %v3473_v20  ;;  %v2590_v39 = vunpack.i.l.bf16 %v3497_v25  ;;  %v627_v33 = vsel %vm48_vm7, %v2441_v16, %v2586_v12 }
 0x338   :  { %2102 = vmatmul.msk.f32.gmra.mxu0 %vm993_vm10, %v3259_v32  ;;  %1116 = vmatpush.msra.mxu1 %v719_v31  ;;  %v2591_v60 = vunpack.i.h.bf16 %v3497_v25 }
 0x339   :  { %v771_v46 = vsel %vm120_vm3, %v2550_v49, %v2565_v21  ;;  %v766_v23 = vsel %vm120_vm3, %v2551_v15, %v2566_v38  ;;  %v720_v15 = vsel %vm96_vm5, %v2561_v13, %v2576_v52  ;;  %v4216_v49 = vunpack.i.l.bf16 %v3331_v18 }
 0x33a   :  { %1117 = vmatpush.msra.mxu1 %v678_v48  ;;  %1165 = vmatpush.msrb.mxu0 %v771_v46  ;;  %v3517_v57 = vpop.permute.xlu2 %2598  ;;  %v679_v40 = vsel %vm72_vm6, %v2570_v10, %v2590_v39  ;;  %v674_v24 = vsel %vm72_vm6, %v2571_v30, %v2591_v60 }
 0x33b   :  { %v2600_v4 = vunpack.i.l.bf16 %v3517_v57 }
 0x33c   :  { %1118 = vmatpush.msra.mxu1 %v673_v27  ;;  %1166 = vmatpush.msrb.mxu0 %v766_v23 }
 0x33d   :  { %1022 = vmatmul.f32.gmra.mxu2 %v3494_v8  ;;  %v633_v18 = vsel %vm48_vm7, %v2585_v17, %v2600_v4  ;;  %v4218_v17 = vmax.f32 %v3138_v47, 0.0 }
 0x33e   :  { %1074 = vmatmul.f32.gmra.mxu3 %v3494_v8  ;;  %v3512_v28 = vpop.permute.xlu1 %2578  ;;  %1119 = vmatpush.msra.mxu1 %v632_v62  ;;  %v2604_v7 = vpop.permute.xlu0 %2603 }
 0x33f   :  { %v2581_v44 = vunpack.i.h.bf16 %v3512_v28  ;;  %v2580_v5 = vunpack.i.l.bf16 %v3512_v28  ;;  %1167 = vmatpush.msrb.mxu0 %v725_v37  ;;  %v2605_v10 = vunpack.i.l.bf16 %v2604_v7  ;;  %v2606_v31 = vunpack.i.h.bf16 %v2604_v7 }
 0x340   :  { %1120 = vmatpush.msra.mxu1 %v627_v33  ;;  %2103 = vmatmul.msk.f32.gmra.mxu0 %vm993_vm10, %v3272_v26 }
 0x341   :  { %1168 = vmatpush.msrb.mxu0 %v720_v15  ;;  %v954_v56 = vsel %vm225_vm0, %v4216_v49, %v2580_v5  ;;  %v949_v16 = vsel %vm225_vm0, %v2546_v50, %v2581_v44  ;;  %v864_v47 = vsel %vm171_vm2, %v2540_v36, %v2605_v10 }
 0x342   :  { %1121 = vmatpush.msra.mxu1 %v3102_v11  ;;  %1147 = vmatpush.msra.mxu2 %v954_v56  ;;  %v2601_v11 = vunpack.i.h.bf16 %v3517_v57  ;;  %v2614_v30 = vpop.permute.xlu2 %2613  ;;  %v4221_v57 = vmax.f32 %v3176_v55, 0.0 }
 0x343   :  { %2291 = vmatpush.msrb.mxu3 %v954_v56  ;;  %1169 = vmatpush.msrb.mxu0 %v679_v40  ;;  %v2615_v1 = vunpack.i.l.bf16 %v2614_v30  ;;  %v2616_v48 = vunpack.i.h.bf16 %v2614_v30 }
 0x344   :  { %1122 = vmatpush.msra.mxu1 %v3077_v19  ;;  %1148 = vmatpush.msra.mxu2 %v949_v16  ;;  %v628_v13 = vsel %vm48_vm7, %v2586_v12, %v2601_v11  ;;  %v859_v12 = vsel %vm171_vm2, %v2541_v22, %v2606_v31 }
 0x345   :  { %2292 = vmatpush.msrb.mxu3 %v949_v16  ;;  %1170 = vmatpush.msrb.mxu0 %v674_v24  ;;  %v818_v23 = vsel %vm144_vm4, %v2555_v58, %v2615_v1  ;;  %v813_v3 = vsel %vm144_vm4, %v2556_v35, %v2616_v48 }
 0x346   :  { %1025 = vmatmul.f32.gmra.mxu2 %v3546_v59  ;;  %1077 = vmatmul.f32.gmra.mxu3 %v3546_v59  ;;  %v2594_v50 = vpop.permute.xlu1 %2593  ;;  %v2619_v46 = vpop.permute.xlu0 %2618 }
 0x347   :  { %1123 = vmatmul.f32.vlgmr.msra.gmra.mxu1 %v3456_v42  ;;  %v2596_v19 = vunpack.i.h.bf16 %v2594_v50  ;;  %v2595_v14 = vunpack.i.l.bf16 %v2594_v50  ;;  %1171 = vmatpush.msrb.mxu0 %v633_v18  ;;  %v2620_v36 = vunpack.i.l.bf16 %v2619_v46  ;;  %v2621_v22 = vunpack.i.h.bf16 %v2619_v46 }
 0x349   :  { %1172 = vmatpush.msrb.mxu0 %v628_v13  ;;  %v910_v61 = vsel %vm198_vm1, %v2530_v6, %v2595_v14  ;;  %v905_v41 = vsel %vm198_vm1, %v2531_v9, %v2596_v19  ;;  %v772_v29 = vsel %vm120_vm3, %v2565_v21, %v2620_v36 }
 0x34a   :  { %1211 = vmatpush.msrb.mxu1 %v910_v61  ;;  %v2629_v35 = vpop.permute.xlu2 %2628 }
 0x34b   :  { %1173 = vmatpush.msrb.mxu0 %v4217_v0  ;;  %v2630_v33 = vunpack.i.l.bf16 %v2629_v35  ;;  %v2631_v49 = vunpack.i.h.bf16 %v2629_v35 }
 0x34c   :  { %1212 = vmatpush.msrb.mxu1 %v905_v41 }
 0x34d   :  { %1174 = vmatpush.msrb.mxu0 %v4218_v17  ;;  %v675_v16 = vsel %vm72_vm6, %v2591_v60, %v2631_v49  ;;  %v4220_v60 = vmax.f32 %v3123_v43, 0.0 }
 0x34e   :  { %2104 = vmatmul.msk.f32.vlgmr.msra.gmra.mxu2 %vm993_vm10, %v3246_v34  ;;  %2106 = vmatmul.msk.f32.vlgmr.msrb.gmra.mxu3 %vm993_vm10, %v3272_v26  ;;  %v3576_v6 = vpop.permute.xlu1 %2608  ;;  %v2634_v15 = vpop.permute.xlu0 %2633 }
 0x34f   :  { %1126 = vmatmul.f32.gmra.mxu1 %v3494_v8  ;;  %1175 = vmatmul.f32.vlgmr.msrb.gmra.mxu0 %v3456_v42  ;;  %v2610_v51 = vunpack.i.l.bf16 %v3576_v6  ;;  %v2611_v9 = vunpack.i.h.bf16 %v3576_v6  ;;  %v2635_v40 = vunpack.i.l.bf16 %v2634_v15 }
 0x350   :  { %1263 = vmatpush.msra.mxu0 %v2595_v14  ;;  %1213 = vmatpush.msrb.mxu1 %v864_v47 }
 0x351   :  { %v955_v27 = vsel %vm225_vm0, %v2580_v5, %v2610_v51  ;;  %v950_v62 = vsel %vm225_vm0, %v2581_v44, %v2611_v9  ;;  %v767_v44 = vsel %vm120_vm3, %v2566_v38, %v2621_v22  ;;  %v634_v50 = vsel %vm48_vm7, %v2600_v4, %v2635_v40 }
 0x352   :  { %1264 = vmatpush.msra.mxu0 %v2596_v19  ;;  %1214 = vmatpush.msrb.mxu1 %v859_v12  ;;  %v4222_v4 = vmax.f32 %v3172_v54, 0.0 }
 0x353   :  { %1199 = vmatpush.msra.mxu3 %v955_v27 }
 0x354   :  { %1265 = vmatpush.msra.mxu0 %v2605_v10  ;;  %1215 = vmatpush.msrb.mxu1 %v818_v23 }
 0x355   :  { %1200 = vmatpush.msra.mxu3 %v950_v62 }
 0x356   :  { %1266 = vmatpush.msra.mxu0 %v2606_v31  ;;  %1216 = vmatpush.msrb.mxu1 %v813_v3  ;;  %v2624_v37 = vpop.permute.xlu1 %2623  ;;  %v3671_v19 = vpop.permute.xlu0 %985 }
 0x357   :  { %1129 = vmatmul.f32.gmra.mxu1 %v3546_v59  ;;  %2105 = vmatmul.msk.f32.gmra.mxu2 %vm993_vm10, %v3259_v32  ;;  %v2625_v58 = vunpack.i.l.bf16 %v2624_v37  ;;  %v2626_v28 = vunpack.i.h.bf16 %v2624_v37 }
 0x358   :  { %1178 = vmatmul.f32.gmra.mxu0 %v3494_v8  ;;  %2107 = vmatmul.msk.f32.vlgmr.msra.gmra.mxu3 %vm993_vm10, %v3246_v34 }
 0x359   :  { %1267 = vmatpush.msra.mxu0 %v2615_v1  ;;  %1217 = vmatpush.msrb.mxu1 %v772_v29  ;;  %v726_v5 = vsel %vm96_vm5, %v2575_v53, %v2625_v58  ;;  %v721_v21 = vsel %vm96_vm5, %v2576_v52, %v2626_v28  ;;  %v680_v53 = vsel %vm72_vm6, %v2590_v39, %v2630_v33  ;;  %v2636_v52 = vunpack.i.h.bf16 %v2634_v15 }
 0x35a   :  { %v4219_v39 = vmax.f32 %v3127_v45, 0.0 }
 0x35b   :  { %1268 = vmatpush.msra.mxu0 %v2616_v48  ;;  %1218 = vmatpush.msrb.mxu1 %v767_v44  ;;  %v629_v25 = vsel %vm48_vm7, %v2601_v11, %v2636_v52 }
 0x35d   :  { %1269 = vmatpush.msra.mxu0 %v2620_v36  ;;  %1219 = vmatpush.msrb.mxu1 %v726_v5 }
 0x35e   :  { %v2639_v56 = vpop.permute.xlu1 %2638 }
 0x35f   :  { %1270 = vmatpush.msra.mxu0 %v2621_v22  ;;  %1220 = vmatpush.msrb.mxu1 %v721_v21  ;;  %v2641_v20 = vunpack.i.h.bf16 %v2639_v56  ;;  %v2640_v38 = vunpack.i.l.bf16 %v2639_v56 }
 0x360   :  { %1181 = vmatmul.f32.gmra.mxu0 %v3546_v59  ;;  %2108 = vmatmul.msk.f32.gmra.mxu3 %vm993_vm10, %v3259_v32 }
 0x361   :  { %1271 = vmatpush.msra.mxu0 %v2625_v58  ;;  %1221 = vmatpush.msrb.mxu1 %v680_v53  ;;  %v956_v63 = vsel %vm225_vm0, %v2610_v51, %v2640_v38  ;;  %v951_v24 = vsel %vm225_vm0, %v2611_v9, %v2641_v20  ;;  %vm1525_vm0 = vcmp.ge.s32.totalorder %v2987_v2, 36 }
 0x362   :  { %1303 = vmatpush.msrb.mxu3 %v2640_v38  ;;  %1251 = vmatpush.msrb.mxu2 %v956_v63 }
 0x363   :  { %1272 = vmatpush.msra.mxu0 %v2626_v28  ;;  %1222 = vmatpush.msrb.mxu1 %v675_v16 }
 0x364   :  { %1304 = vmatpush.msrb.mxu3 %v2641_v20  ;;  %1252 = vmatpush.msrb.mxu2 %v951_v24 }
 0x365   :  { %1273 = vmatpush.msra.mxu0 %v2630_v33  ;;  %1223 = vmatpush.msrb.mxu1 %v634_v50 }
 0x366   :  { %2110 = vmatmul.msk.f32.vlgmr.msrb.gmra.mxu2 %vm993_vm10, %v3246_v34  ;;  %v1046_v43 = vpop.f32.mrf.mxu3  ;;  %v991_v3 = vpop.permute.xlu1 %990 }
 0x367   :  { %1274 = vmatpush.msra.mxu0 %v2631_v49  ;;  %1224 = vmatpush.msrb.mxu1 %v629_v25 }
 0x368   :  { %2109 = vmatmul.msk.f32.gmra.mxu3 %vm993_vm10, %v3272_v26 }
 0x369   :  { %1275 = vmatpush.msra.mxu0 %v2635_v40  ;;  %1225 = vmatpush.msrb.mxu1 %v4219_v39 }
 0x36b   :  { %1276 = vmatpush.msra.mxu0 %v2636_v52  ;;  %1226 = vmatpush.msrb.mxu1 %v4220_v60 }
 0x36c   :  { %1227 = vmatmul.f32.vlgmr.msrb.gmra.mxu1 %v3456_v42 }
 0x36d   :  { %1277 = vmatpush.msra.mxu0 %v4221_v57 }
 0x36e   :  { %2111 = vmatmul.msk.f32.gmra.mxu2 %vm993_vm10, %v3259_v32  ;;  %v1049_v45 = vpop.f32.mrf.mxu3 }
 0x36f   :  { %1278 = vmatpush.msra.mxu0 %v4222_v4 }
 0x370   :  { %1279 = vmatmul.f32.vlgmr.msra.gmra.mxu0 %v3456_v42  ;;  %2113 = vmatmul.msk.f32.vlgmr.msrb.gmra.mxu3 %vm993_vm10, %v3246_v34  ;;  %v3661_v34 = vpop.permute.xlu2 %980 }
 0x374   :  { %1230 = vmatmul.f32.gmra.mxu1 %v3494_v8 }
 0x376   :  { %2112 = vmatmul.msk.f32.gmra.mxu2 %vm993_vm10, %v3272_v26  ;;  %v1052_v54 = vpop.f32.mrf.mxu3 }
 0x378   :  { %1282 = vmatmul.f32.gmra.mxu0 %v3494_v8  ;;  %2114 = vmatmul.msk.f32.gmra.mxu3 %vm993_vm10, %v3259_v32 }
 0x37c   :  { %1233 = vmatmul.f32.gmra.mxu1 %v3546_v59 }
 0x380   :  { %1285 = vmatmul.f32.gmra.mxu0 %v3546_v59  ;;  %2115 = vmatmul.msk.f32.gmra.mxu3 %vm993_vm10, %v3272_v26 }
 0x3ad   :  { %v1098_v55 = vpop.f32.mrf.mxu0 }
 0x3b5   :  { %v1101_v59 = vpop.f32.mrf.mxu0 }
 0x3b8   :  { %v1020_v42 = vpop.f32.mrf.mxu2 }
 0x3b9   :  { %v1021_v11 = vadd.f32 %v1020_v42, %v3661_v34  ;;  %v1072_v8 = vpop.f32.mrf.mxu3 }
 0x3ba   :  { %v1073_v18 = vadd.f32 %v1072_v8, %v3661_v34 }
 0x3bb   :  { %v3665_v32 = vadd.f32 %v1046_v43, %v1021_v11 }
 0x3bc   :  { %v3667_v7 = vadd.f32 %v1098_v55, %v1073_v18 }
 0x3bd   :  { %v1104_v31 = vpop.f32.mrf.mxu0 }
 0x3be   :  { %v2642_v26 = vpack.i.bf16 %v3667_v7, %v3665_v32 }
 0x3c0   :  { %2643 = vrot.lane.b32.xlu2 %v2642_v26, %s2723_s16  ;;  %v1023_v14 = vpop.f32.mrf.mxu2 }
 0x3c1   :  { %v1024_v13 = vadd.f32 %v1023_v14, %v3671_v19  ;;  %v1075_v61 = vpop.f32.mrf.mxu3 }
 0x3c2   :  { %v1076_v10 = vadd.f32 %v1075_v61, %v3671_v19 }
 0x3c3   :  { %v3676_v0 = vadd.f32 %v1049_v45, %v1024_v13 }
 0x3c4   :  { %v3678_v41 = vadd.f32 %v1101_v59, %v1076_v10  ;;  %v1124_v6 = vpop.f32.mrf.mxu1 }
 0x3c5   :  { %v1125_v46 = vadd.f32 %v1124_v6, %v3661_v34 }
 0x3c6   :  { %v2652_v30 = vpack.i.bf16 %v3678_v41, %v3676_v0 }
 0x3c8   :  { %2653 = vrot.lane.b32.xlu1 %v2652_v30, %s2723_s16 }
 0x3c9   :  { %v1078_v17 = vpop.f32.mrf.mxu3  ;;  %v1026_v1 = vpop.f32.mrf.mxu2 }
 0x3ca   :  { %v1027_v22 = vadd.f32 %v1026_v1, %v991_v3  ;;  %v1079_v37 = vadd.f32 %v1078_v17, %v991_v3 }
 0x3cc   :  { %v1176_v51 = vpop.f32.mrf.mxu0  ;;  %v1127_v9 = vpop.f32.mrf.mxu1  ;;  %v3692_v28 = vadd.f32 %v1052_v54, %v1027_v22  ;;  %v3694_v44 = vadd.f32 %v1104_v31, %v1079_v37 }
 0x3cd   :  { %v1177_v12 = vadd.f32 %v1176_v51, %v3661_v34  ;;  %v1128_v5 = vadd.f32 %v1127_v9, %v3671_v19 }
 0x3ce   :  { %v2662_v38 = vpack.i.bf16 %v3694_v44, %v3692_v28 }
 0x3d1   :  { %v1156_v47 = vpop.f32.mrf.mxu3  ;;  %v1150_v48 = vpop.f32.mrf.mxu2 }
 0x3d2   :  { %v3685_v36 = vadd.f32 %v1150_v48, %v1125_v46 }
 0x3d4   :  { %v1130_v29 = vpop.f32.mrf.mxu1 }
 0x3d5   :  { %v1179_v27 = vpop.f32.mrf.mxu0  ;;  %v1131_v40 = vadd.f32 %v1130_v29, %v991_v3 }
 0x3d6   :  { %v1180_v33 = vadd.f32 %v1179_v27, %v3671_v19 }
 0x3d7   :  { %v3709_v24 = vadd.f32 %v1156_v47, %v1131_v40 }
 0x3da   :  { %v1153_v35 = vpop.f32.mrf.mxu2 }
 0x3db   :  { %v1202_v23 = vpop.f32.mrf.mxu3  ;;  %v3698_v49 = vadd.f32 %v1153_v35, %v1128_v5 }
 0x3dc   :  { %v3687_v62 = vadd.f32 %v1202_v23, %v1177_v12 }
 0x3dd   :  { %v1182_v56 = vpop.f32.mrf.mxu0 }
 0x3de   :  { %v2647_v58 = vpack.i.bf16 %v3687_v62, %v3685_v36  ;;  %v1183_v4 = vadd.f32 %v1182_v56, %v991_v3 }
 0x3e0   :  { %2648 = vrot.lane.b32.xlu0 %v2647_v58, %s2723_s16 }
 0x3e3   :  { %v1205_v15 = vpop.f32.mrf.mxu3 }
 0x3e4   :  { %v3700_v21 = vadd.f32 %v1205_v15, %v1180_v33 }
 0x3e6   :  { %v2657_v20 = vpack.i.bf16 %v3700_v21, %v3698_v49 }
 0x3e8   :  { %2663 = vrot.lane.b32.xlu0 %v2662_v38, %s2723_s16  ;;  %2658 = vrot.lane.b32.xlu2 %v2657_v20, %s2723_s16 }
 0x3e9   :  { %v1228_v53 = vpop.f32.mrf.mxu1  ;;  %v1254_v63 = vpop.f32.mrf.mxu2 }
 0x3ea   :  { %v1229_v52 = vadd.f32 %v1228_v53, %v3661_v34 }
 0x3eb   :  { %v1208_v16 = vpop.f32.mrf.mxu3 }
 0x3ec   :  { %v3711_v50 = vadd.f32 %v1254_v63, %v1229_v52  ;;  %v3718_v55 = vadd.f32 %v1208_v16, %v1183_v4 }
 0x3ed   :  { %v1280_v25 = vpop.f32.mrf.mxu0 }
 0x3ee   :  { %v2667_v39 = vpack.i.bf16 %v3711_v50, %v3709_v24  ;;  %v1281_v43 = vadd.f32 %v1280_v25, %v3661_v34 }
 0x3f0   :  { %2668 = vrot.lane.b32.xlu1 %v2667_v39, %s2723_s16 }
 0x3f1   :  { %v1231_v60 = vpop.f32.mrf.mxu1  ;;  %v1257_v57 = vpop.f32.mrf.mxu2 }
 0x3f2   :  { %v1232_v45 = vadd.f32 %v1231_v60, %v3671_v19 }
 0x3f3   :  { %v1306_v54 = vpop.f32.mrf.mxu3 }
 0x3f4   :  { %v3720_v42 = vadd.f32 %v1257_v57, %v1232_v45  ;;  %v1307_v11 = vadd.f32 %v1306_v54, %v1281_v43 }
 0x3f5   :  { %v1283_v8 = vpop.f32.mrf.mxu0 }
 0x3f6   :  { %v2672_v18 = vpack.i.bf16 %v3720_v42, %v3718_v55  ;;  %1343 = vrot.lane.b32.xlu2 %v1307_v11, %s2723_s16  ;;  %v1284_v34 = vadd.f32 %v1283_v8, %v3671_v19  ;;  %v4223_v19 = vmov 0  }
 0x3f7   :  { %v1526_v1 = vsel %vm1525_vm0, 1, %v4223_v19 }
 0x3f8   :  { %2673 = vrot.lane.b32.xlu0 %v2672_v18, %s2723_s16  ;;  %v1527_v51 = vmul.u32 36, %v1526_v1  ;;  %v1545_v45 = vmul.u32 512, %v1526_v1 }
 0x3f9   :  { %v1234_v59 = vpop.f32.mrf.mxu1  ;;  %v1260_v26 = vpop.f32.mrf.mxu2 }
 0x3fa   :  { %v1235_v14 = vadd.f32 %v1234_v59, %v991_v3  ;;  %v1528_v47 = vsub.s32 %v2987_v2, %v1527_v51 }
 0x3fb   :  { %v1309_v13 = vpop.f32.mrf.mxu3 }
 0x3fc   :  { %v3727_v61 = vadd.f32 %v1260_v26, %v1235_v14  ;;  %v3729_v10 = vadd.f32 %v1309_v13, %v1284_v34  ;;  %vm1529_vm1 = vcmp.ge.s32.totalorder %v1528_v47, 6  ;;  %vm1531_vm2 = vcmp.ge.s32.totalorder %v1528_v47, 12 }
 0x3fd   :  { %v1286_v30 = vpop.f32.mrf.mxu0  ;;  %v1530_v48 = vsel %vm1529_vm1, 1, %v4223_v19  ;;  %v1532_v46 = vsel %vm1531_vm2, 1, %v4223_v19  ;;  %vm1534_vm3 = vcmp.ge.s32.totalorder %v1528_v47, 18  ;;  %vm1537_vm4 = vcmp.ge.s32.totalorder %v1528_v47, 24 }
 0x3fe   :  { %1355 = vrot.lane.b32.xlu1 %v3729_v10, %s2723_s16  ;;  %1365 = vrot.lane.b32.xlu2 %v3727_v61, %s2723_s16  ;;  %v1287_v31 = vadd.f32 %v1286_v30, %v991_v3  ;;  %v1533_v12 = vadd.s32 %v1532_v46, %v1530_v48  ;;  %v1535_v23 = vsel %vm1534_vm3, 1, %v4223_v19  ;;  %v1538_v29 = vsel %vm1537_vm4, 1, %v4223_v19 }
 0x3ff   :  { %vm1540_vm6 = vcmp.ge.s32.totalorder %v1528_v47, 30 }
 0x400   :  { %v1536_v58 = vadd.s32 %v1535_v23, %v1533_v12  ;;  %v1541_v38 = vsel %vm1540_vm6, 1, %v4223_v19 }
 0x402   :  { %v1539_v56 = vadd.s32 %v1538_v29, %v1536_v58 }
 0x403   :  { %v1312_v17 = vpop.f32.mrf.mxu3 }
 0x404   :  { %v3735_v6 = vadd.f32 %v1312_v17, %v1287_v31  ;;  %v1542_v40 = vadd.s32 %v1541_v38, %v1539_v56  ;;  %v4224_v17 = vlaneseq }
 0x406   :  { %1367 = vrot.lane.b32.xlu0 %v3735_v6, %s2723_s16  ;;  %v1543_v16 = vmul.u32 6, %v1542_v40  ;;  %v1546_v54 = vmul.u32 32, %v1542_v40 }
 0x408   :  { %v1544_v43 = vsub.s32 %v1528_v47, %v1543_v16  ;;  %v1547_v14 = vadd.s32 %v1546_v54, %v1545_v45 }
 0x40a   :  { %v1548_v13 = vmul.u32 2, %v1544_v43 }
 0x41a   :  { %v2644_v9 = vpop.permute.xlu2 %2643 }
 0x41b   :  { %v2646_v53 = vunpack.i.h.bf16 %v2644_v9  ;;  %v2645_v63 = vunpack.i.l.bf16 %v2644_v9 }
 0x41d   :  { %v1369_v39 = vsel %vm48_vm7, %v2645_v63, %v2646_v53 }
 0x41e   :  { %v3786_v26 = vmax.f32 %v3665_v32, %v1369_v39 }
 0x43a   :  { %v2654_v27 = vpop.permute.xlu1 %2653 }
 0x43b   :  { %v2656_v22 = vunpack.i.h.bf16 %v2654_v27  ;;  %v2655_v52 = vunpack.i.l.bf16 %v2654_v27 }
 0x43d   :  { %v1374_v60 = vsel %vm48_vm7, %v2655_v52, %v2656_v22 }
 0x43e   :  { %v3783_v59 = vmax.f32 %v3676_v0, %v1374_v60 }
 0x442   :  { %v3745_v3 = vpop.permute.xlu2 %2658 }
 0x443   :  { %v2661_v37 = vunpack.i.h.bf16 %v3745_v3  ;;  %v2660_v2 = vunpack.i.l.bf16 %v3745_v3 }
 0x445   :  { %v1375_v35 = vsel %vm48_vm7, %v2656_v22, %v2660_v2  ;;  %v1376_v5 = vsel %vm48_vm7, %v2660_v2, %v2661_v37  ;;  %v2726_v22 = vmov 1.0  }
 0x446   :  { %v3755_v33 = vmax.f32 %v3678_v41, %v1375_v35  ;;  %v3758_v15 = vmax.f32 %v3698_v49, %v1376_v5 }
 0x448   :  { %v2687_v20 = vpack.i.bf16 %v3758_v15, %v3755_v33 }
 0x44a   :  { %2688 = vrot.lane.b32.xlu0 %v2687_v20, %s2721_s14 }
 0x450   :  { %v3764_v25 = vpop.permute.xlu2 %1343 }
 0x451   :  { %v3767_v41 = vmax.f32 %v1307_v11, %v3764_v25 }
 0x452   :  { %v3769_v49 = vpop.permute.xlu0 %2648 }
 0x453   :  { %v2651_v57 = vunpack.i.h.bf16 %v3769_v49  ;;  %v2650_v4 = vunpack.i.l.bf16 %v3769_v49  ;;  %1448 = vrot.lane.b32.xlu0 %v3767_v41, %s2721_s14 }
 0x455   :  { %v1370_v8 = vsel %vm48_vm7, %v2646_v53, %v2650_v4  ;;  %v1371_v11 = vsel %vm48_vm7, %v2650_v4, %v2651_v57 }
 0x456   :  { %v3780_v18 = vmax.f32 %v3685_v36, %v1371_v11  ;;  %v3789_v34 = vmax.f32 %v3667_v7, %v1370_v8  ;;  %v3796_v36 = vshrl.u32 %v4224_v17, 7  ;;  %v3800_v7 = vadd.s32 %v1548_v13, %v1547_v14 }
 0x458   :  { %v2682_v30 = vpack.i.bf16 %v3783_v59, %v3780_v18  ;;  %v2677_v31 = vpack.i.bf16 %v3789_v34, %v3786_v26  ;;  %v1598_v47 = vadd.s32 376, %v3796_v36  ;;  %v1614_v9 = vadd.s32 504, %v3796_v36  ;;  %v1366_v54 = vpop.permute.xlu2 %1365 }
 0x459   :  { %v1566_v48 = vadd.s32 120, %v3796_v36  ;;  %v1597_v46 = vadd.s32 368, %v3796_v36  ;;  %v1613_v12 = vadd.s32 496, %v3796_v36  ;;  %v1565_v27 = vadd.s32 112, %v3796_v36 }
 0x45a   :  { %v2664_v19 = vpop.permute.xlu0 %2663  ;;  %2683 = vrot.lane.b32.xlu2 %v2682_v30, %s2721_s14  ;;  %2678 = vrot.lane.b32.xlu1 %v2677_v31, %s2721_s14  ;;  %vm1684_vm11 = vcmp.eq.s32.totalorder %v1598_v47, %v3800_v7  ;;  %vm1700_vm12 = vcmp.eq.s32.totalorder %v1614_v9, %v3800_v7  ;;  %v1596_v23 = vadd.s32 360, %v3796_v36  ;;  %v1564_v2 = vadd.s32 104, %v3796_v36 }
 0x45b   :  { %v2666_v32 = vunpack.i.h.bf16 %v2664_v19  ;;  %v2665_v0 = vunpack.i.l.bf16 %v2664_v19  ;;  %2234 = vmatpush.msk.msra.mxu3 %vm1684_vm11, %v2726_v22  ;;  %2250 = vmatpush.msk.msrb.mxu0 %vm1700_vm12, %v2726_v22  ;;  %vm1652_vm13 = vcmp.eq.s32.totalorder %v1566_v48, %v3800_v7  ;;  %vm1683_vm14 = vcmp.eq.s32.totalorder %v1597_v46, %v3800_v7 }
 0x45c   :  { %vm1699_vm15 = vcmp.eq.s32.totalorder %v1613_v12, %v3800_v7  ;;  %2202 = vmatpush.msk.msra.mxu2 %vm1652_vm13, %v2726_v22  ;;  %vm1651_vm9 = vcmp.eq.s32.totalorder %v1565_v27, %v3800_v7  ;;  %vm1682_vm10 = vcmp.eq.s32.totalorder %v1596_v23, %v3800_v7  ;;  %v1595_v29 = vadd.s32 352, %v3796_v36 }
 0x45d   :  { %v1379_v1 = vsel %vm48_vm7, %v2665_v0, %v2666_v32  ;;  %2235 = vmatpush.msk.msra.mxu3 %vm1683_vm14, %v2726_v22  ;;  %2251 = vmatpush.msk.msrb.mxu0 %vm1699_vm15, %v2726_v22  ;;  %vm1650_vm1 = vcmp.eq.s32.totalorder %v1564_v2, %v3800_v7  ;;  %v1611_v56 = vadd.s32 480, %v3796_v36  ;;  %v1563_v20 = vadd.s32 96, %v3796_v36 }
 0x45e   :  { %v3804_v51 = vmax.f32 %v3692_v28, %v1379_v1  ;;  %v1612_v28 = vadd.s32 488, %v3796_v36  ;;  %2203 = vmatpush.msk.msra.mxu2 %vm1651_vm9, %v2726_v22  ;;  %vm1681_vm2 = vcmp.eq.s32.totalorder %v1595_v29, %v3800_v7  ;;  %v1582_v38 = vadd.s32 248, %v3796_v36 }
 0x45f   :  { %v1594_v40 = vadd.s32 344, %v3796_v36  ;;  %2236 = vmatpush.msk.msra.mxu3 %vm1682_vm10, %v2726_v22  ;;  %v1610_v16 = vadd.s32 472, %v3796_v36  ;;  %vm1697_vm3 = vcmp.eq.s32.totalorder %v1611_v56, %v3800_v7  ;;  %vm1649_vm4 = vcmp.eq.s32.totalorder %v1563_v20, %v3800_v7 }
 0x460   :  { %vm1698_vm0 = vcmp.eq.s32.totalorder %v1612_v28, %v3800_v7  ;;  %2204 = vmatpush.msk.msra.mxu2 %vm1650_vm1, %v2726_v22  ;;  %vm1668_vm6 = vcmp.eq.s32.totalorder %v1582_v38, %v3800_v7  ;;  %v1609_v0 = vadd.s32 464, %v3796_v36  ;;  %v1561_v1 = vadd.s32 80, %v3796_v36 }
 0x461   :  { %2252 = vmatpush.msk.msrb.mxu0 %vm1698_vm0, %v2726_v22  ;;  %2237 = vmatpush.msk.msra.mxu3 %vm1681_vm2, %v2726_v22  ;;  %vm1680_vm11 = vcmp.eq.s32.totalorder %v1594_v40, %v3800_v7  ;;  %vm1696_vm12 = vcmp.eq.s32.totalorder %v1610_v16, %v3800_v7  ;;  %v1592_v47 = vadd.s32 328, %v3796_v36  ;;  %v1560_v9 = vadd.s32 72, %v3796_v36 }
 0x462   :  { %v2669_v58 = vpop.permute.xlu1 %2668  ;;  %2205 = vmatpush.msk.msra.mxu2 %vm1649_vm4, %v2726_v22  ;;  %2218 = vmatpush.msk.msra.mxu1 %vm1668_vm6, %v2726_v22  ;;  %vm1695_vm15 = vcmp.eq.s32.totalorder %v1609_v0, %v3800_v7  ;;  %vm1647_vm9 = vcmp.eq.s32.totalorder %v1561_v1, %v3800_v7  ;;  %v1579_v48 = vadd.s32 224, %v3796_v36  ;;  %v1591_v46 = vadd.s32 320, %v3796_v36 }
 0x463   :  { %v2671_v35 = vunpack.i.h.bf16 %v2669_v58  ;;  %v2670_v5 = vunpack.i.l.bf16 %v2669_v58  ;;  %2253 = vmatpush.msk.msrb.mxu0 %vm1697_vm3, %v2726_v22  ;;  %2238 = vmatpush.msk.msra.mxu3 %vm1680_vm11, %v2726_v22  ;;  %vm1678_vm0 = vcmp.eq.s32.totalorder %v1592_v47, %v3800_v7  ;;  %vm1646_vm2 = vcmp.eq.s32.totalorder %v1560_v9, %v3800_v7 }
 0x464   :  { %v1607_v12 = vadd.s32 448, %v3796_v36  ;;  %v1559_v27 = vadd.s32 64, %v3796_v36  ;;  %vm1665_vm3 = vcmp.eq.s32.totalorder %v1579_v48, %v3800_v7  ;;  %v1578_v23 = vadd.s32 216, %v3796_v36 }
 0x465   :  { %v1372_v53 = vsel %vm48_vm7, %v2651_v57, %v2671_v35  ;;  %v1373_v63 = vsel %vm48_vm7, %v2671_v35, %v3764_v25  ;;  %v1380_v52 = vsel %vm48_vm7, %v2666_v32, %v2670_v5  ;;  %2254 = vmatpush.msk.msrb.mxu0 %vm1696_vm12, %v2726_v22  ;;  %v1593_v32 = vadd.s32 336, %v3796_v36 }
 0x466   :  { %v3848_v49 = vmax.f32 %v3687_v62, %v1372_v53  ;;  %v3851_v39 = vmax.f32 %v3711_v50, %v1373_v63  ;;  %v3854_v25 = vmax.f32 %v3694_v44, %v1380_v52  ;;  %v1562_v62 = vadd.s32 88, %v3796_v36 }
 0x467   :  { %vm1679_vm14 = vcmp.eq.s32.totalorder %v1593_v32, %v3800_v7  ;;  %2255 = vmatpush.msk.msrb.mxu0 %vm1695_vm15, %v2726_v22  ;;  %v1590_v28 = vadd.s32 312, %v3796_v36  ;;  %v1606_v2 = vadd.s32 440, %v3796_v36  ;;  %vm1677_vm4 = vcmp.eq.s32.totalorder %v1591_v46, %v3800_v7 }
 0x468   :  { %v2697_v44 = vpack.i.bf16 %v3851_v39, %v3848_v49  ;;  %v2692_v50 = vpack.i.bf16 %v3854_v25, %v3804_v51  ;;  %vm1648_vm13 = vcmp.eq.s32.totalorder %v1562_v62, %v3800_v7  ;;  %2239 = vmatpush.msk.msra.mxu3 %vm1679_vm14, %v2726_v22  ;;  %vm1693_vm6 = vcmp.eq.s32.totalorder %v1607_v12, %v3800_v7 }
 0x469   :  { %2206 = vmatpush.msk.msra.mxu2 %vm1648_vm13, %v2726_v22  ;;  %vm1645_vm11 = vcmp.eq.s32.totalorder %v1559_v27, %v3800_v7  ;;  %v1558_v58 = vadd.s32 56, %v3796_v36  ;;  %vm1664_vm12 = vcmp.eq.s32.totalorder %v1578_v23, %v3800_v7  ;;  %vm1676_vm13 = vcmp.eq.s32.totalorder %v1590_v28, %v3800_v7 }
 0x46a   :  { %v2674_v60 = vpop.permute.xlu0 %2673  ;;  %2698 = vrot.lane.b32.xlu2 %v2697_v44, %s2721_s14  ;;  %2693 = vrot.lane.b32.xlu1 %v2692_v50, %s2721_s14  ;;  %v1577_v29 = vadd.s32 208, %v3796_v36  ;;  %v1589_v35 = vadd.s32 304, %v3796_v36  ;;  %v1557_v56 = vadd.s32 48, %v3796_v36  ;;  %v1576_v20 = vadd.s32 200, %v3796_v36 }
 0x46b   :  { %v2676_v57 = vunpack.i.h.bf16 %v2674_v60  ;;  %v2675_v4 = vunpack.i.l.bf16 %v2674_v60  ;;  %2207 = vmatpush.msk.msra.mxu2 %vm1647_vm9, %v2726_v22  ;;  %2240 = vmatpush.msk.msra.mxu3 %vm1678_vm0, %v2726_v22  ;;  %vm1644_vm14 = vcmp.eq.s32.totalorder %v1558_v58, %v3800_v7  ;;  %v1588_v38 = vadd.s32 296, %v3796_v36 }
 0x46c   :  { %v1604_v40 = vadd.s32 424, %v3796_v36  ;;  %vm1663_vm15 = vcmp.eq.s32.totalorder %v1577_v29, %v3800_v7  ;;  %vm1675_vm9 = vcmp.eq.s32.totalorder %v1589_v35, %v3800_v7  ;;  %v1556_v53 = vadd.s32 40, %v3796_v36 }
 0x46d   :  { %v1377_v43 = vsel %vm48_vm7, %v2661_v37, %v2676_v57  ;;  %v1381_v45 = vsel %vm48_vm7, %v2670_v5, %v2675_v4  ;;  %v1382_v14 = vsel %vm48_vm7, %v2675_v4, %v1366_v54  ;;  %2208 = vmatpush.msk.msra.mxu2 %vm1646_vm2, %v2726_v22  ;;  %2241 = vmatpush.msk.msra.mxu3 %vm1677_vm4, %v2726_v22  ;;  %v1605_v5 = vadd.s32 432, %v3796_v36 }
 0x46e   :  { %v3884_v8 = vmax.f32 %v3700_v21, %v1377_v43  ;;  %v3887_v11 = vmax.f32 %v3709_v24, %v1381_v45  ;;  %v3901_v21 = vmax.f32 %v3718_v55, %v1382_v14  ;;  %v1581_v55 = vadd.s32 240, %v3796_v36 }
 0x46f   :  { %2209 = vmatpush.msk.msra.mxu2 %vm1645_vm11, %v2726_v22  ;;  %2242 = vmatpush.msk.msra.mxu3 %vm1676_vm13, %v2726_v22  ;;  %vm1643_vm0 = vcmp.eq.s32.totalorder %v1557_v56, %v3800_v7  ;;  %vm1674_vm2 = vcmp.eq.s32.totalorder %v1588_v38, %v3800_v7  ;;  %v1575_v63 = vadd.s32 192, %v3796_v36  ;;  %vm1642_vm4 = vcmp.eq.s32.totalorder %v1556_v53, %v3800_v7 }
 0x470   :  { %v1356_v13 = vpop.permute.xlu1 %1355  ;;  %v2702_v30 = vpack.i.bf16 %v3884_v8, %v3887_v11  ;;  %v1587_v52 = vadd.s32 288, %v3796_v36  ;;  %v1603_v16 = vadd.s32 416, %v3796_v36  ;;  %v1555_v62 = vadd.s32 32, %v3796_v36 }
 0x471   :  { %v1378_v31 = vsel %vm48_vm7, %v2676_v57, %v1356_v13  ;;  %v3894_v3 = vmax.f32 %v3729_v10, %v1356_v13  ;;  %2210 = vmatpush.msk.msra.mxu2 %vm1644_vm14, %v2726_v22  ;;  %2243 = vmatpush.msk.msra.mxu3 %vm1675_vm9, %v2726_v22  ;;  %v1574_v44 = vadd.s32 184, %v3796_v36  ;;  %v1586_v50 = vadd.s32 280, %v3796_v36 }
 0x472   :  { %v3897_v37 = vmax.f32 %v3720_v42, %v1378_v31  ;;  %2703 = vrot.lane.b32.xlu1 %v2702_v30, %s2721_s14  ;;  %vm1673_vm11 = vcmp.eq.s32.totalorder %v1587_v52, %v3800_v7  ;;  %v1602_v60 = vadd.s32 408, %v3796_v36  ;;  %v1554_v57 = vadd.s32 24, %v3796_v36 }
 0x473   :  { %1460 = vrot.lane.b32.xlu0 %v3894_v3, %s2721_s14  ;;  %2211 = vmatpush.msk.msra.mxu2 %vm1643_vm0, %v2726_v22  ;;  %vm1641_vm13 = vcmp.eq.s32.totalorder %v1555_v62, %v3800_v7  ;;  %vm1672_vm14 = vcmp.eq.s32.totalorder %v1586_v50, %v3800_v7  ;;  %v1573_v4 = vadd.s32 176, %v3796_v36  ;;  %v1585_v43 = vadd.s32 272, %v3796_v36 }
 0x474   :  { %v2707_v24 = vpack.i.bf16 %v3901_v21, %v3897_v37  ;;  %2244 = vmatpush.msk.msra.mxu3 %vm1674_vm2, %v2726_v22  ;;  %vm1640_vm9 = vcmp.eq.s32.totalorder %v1554_v57, %v3800_v7  ;;  %v1601_v45 = vadd.s32 400, %v3796_v36  ;;  %v1572_v14 = vadd.s32 168, %v3796_v36 }
 0x475   :  { %2212 = vmatpush.msk.msra.mxu2 %vm1642_vm4, %v2726_v22  ;;  %v1584_v13 = vadd.s32 264, %v3796_v36  ;;  %v1600_v30 = vadd.s32 392, %v3796_v36  ;;  %v1552_v31 = vadd.s32 8, %v3796_v36  ;;  %vm1671_vm0 = vcmp.eq.s32.totalorder %v1585_v43, %v3800_v7 }
 0x476   :  { %2708 = vrot.lane.b32.xlu2 %v2707_v24, %s2721_s14  ;;  %2245 = vmatpush.msk.msra.mxu3 %vm1673_vm11, %v2726_v22  ;;  %v1571_v24 = vadd.s32 160, %v3796_v36  ;;  %v1630_v32 = vadd.s32 632, %v3796_v36  ;;  %v1569_v0 = vadd.s32 144, %v3796_v36  ;;  %v1629_v1 = vadd.s32 624, %v3796_v36 }
 0x477   :  { %2213 = vmatpush.msk.msra.mxu2 %vm1641_vm13, %v2726_v22  ;;  %vm1670_vm4 = vcmp.eq.s32.totalorder %v1584_v13, %v3800_v7  ;;  %vm1638_vm11 = vcmp.eq.s32.totalorder %v1552_v31, %v3800_v7  ;;  %vm1637_vm13 = vcmp.eq.s32.totalorder %v3796_v36, %v3800_v7  ;;  %v1628_v47 = vadd.s32 616, %v3796_v36 }
 0x478   :  { %v1368_v17 = vpop.permute.xlu0 %1367  ;;  %2246 = vmatpush.msk.msra.mxu3 %vm1672_vm14, %v2726_v22  ;;  %v1627_v9 = vadd.s32 608, %v3796_v36  ;;  %v1626_v48 = vadd.s32 600, %v3796_v36  ;;  %v1625_v46 = vadd.s32 592, %v3796_v36  ;;  %v1624_v12 = vadd.s32 584, %v3796_v36 }
 0x479   :  { %v1383_v10 = vsel %vm48_vm7, %v1366_v54, %v1368_v17  ;;  %v3913_v42 = vmax.f32 %v3735_v6, %v1368_v17  ;;  %v1608_v6 = vadd.s32 456, %v3796_v36  ;;  %vm1667_vm7 = vcmp.eq.s32.totalorder %v1581_v55, %v3800_v7  ;;  %2214 = vmatpush.msk.msra.mxu2 %vm1640_vm9, %v2726_v22 }
 0x47a   :  { %v3910_v19 = vmax.f32 %v3727_v61, %v1383_v10  ;;  %v1580_v61 = vadd.s32 232, %v3796_v36  ;;  %2219 = vmatpush.msk.msra.mxu1 %vm1667_vm7, %v2726_v22  ;;  %vm1692_vm7 = vcmp.eq.s32.totalorder %v1606_v2, %v3800_v7  ;;  %v1553_v54 = vadd.s32 16, %v3796_v36  ;;  %2247 = vmatpush.msk.msra.mxu3 %vm1671_vm0, %v2726_v22 }
 0x47b   :  { %vm1694_vm1 = vcmp.eq.s32.totalorder %v1608_v6, %v3800_v7  ;;  %v1583_v17 = vadd.s32 256, %v3796_v36  ;;  %v1599_v10 = vadd.s32 384, %v3796_v36  ;;  %v1570_v55 = vadd.s32 152, %v3796_v36 }
 0x47c   :  { %1470 = vrot.lane.b32.xlu1 %v3910_v19, %s2721_s14  ;;  %vm1666_vm10 = vcmp.eq.s32.totalorder %v1580_v61, %v3800_v7  ;;  %2256 = vmatpush.msk.msrb.mxu0 %vm1694_vm1, %v2726_v22  ;;  %vm1662_vm1 = vcmp.eq.s32.totalorder %v1576_v20, %v3800_v7  ;;  %vm1639_vm2 = vcmp.eq.s32.totalorder %v1553_v54, %v3800_v7  ;;  %v1568_v61 = vadd.s32 136, %v3796_v36 }
 0x47d   :  { %2220 = vmatpush.msk.msra.mxu1 %vm1666_vm10, %v2726_v22  ;;  %vm1691_vm10 = vcmp.eq.s32.totalorder %v1605_v5, %v3800_v7  ;;  %2215 = vmatpush.msk.msra.mxu2 %vm1639_vm2, %v2726_v22  ;;  %vm1685_vm14 = vcmp.eq.s32.totalorder %v1599_v10, %v3800_v7  ;;  %vm1716_vm9 = vcmp.eq.s32.totalorder %v1630_v32, %v3800_v7  ;;  %v1567_v6 = vadd.s32 128, %v3796_v36 }
 0x47e   :  { %1472 = vrot.lane.b32.xlu2 %v3913_v42, %s2721_s14  ;;  %2257 = vmatpush.msk.msrb.mxu0 %vm1693_vm6, %v2726_v22  ;;  %vm1661_vm6 = vcmp.eq.s32.totalorder %v1575_v63, %v3800_v7  ;;  %vm1715_vm0 = vcmp.eq.s32.totalorder %v1629_v1, %v3800_v7  ;;  %vm1714_vm2 = vcmp.eq.s32.totalorder %v1628_v47, %v3800_v7  ;;  %v1623_v27 = vadd.s32 576, %v3796_v36 }
 0x47f   :  { %2221 = vmatpush.msk.msra.mxu1 %vm1665_vm3, %v2726_v22  ;;  %vm1690_vm3 = vcmp.eq.s32.totalorder %v1604_v40, %v3800_v7  ;;  %2248 = vmatpush.msk.msra.mxu3 %vm1670_vm4, %v2726_v22  ;;  %vm1713_vm4 = vcmp.eq.s32.totalorder %v1627_v9, %v3800_v7  ;;  %v1622_v23 = vadd.s32 568, %v3796_v36  ;;  %v1621_v2 = vadd.s32 560, %v3796_v36 }
 0x480   :  { %2258 = vmatpush.msk.msrb.mxu0 %vm1692_vm7, %v2726_v22  ;;  %vm1660_vm7 = vcmp.eq.s32.totalorder %v1574_v44, %v3800_v7  ;;  %2216 = vmatpush.msk.msra.mxu2 %vm1638_vm11, %v2726_v22  ;;  %vm1711_vm11 = vcmp.eq.s32.totalorder %v1625_v46, %v3800_v7  ;;  %v1620_v58 = vadd.s32 552, %v3796_v36  ;;  %v1619_v29 = vadd.s32 544, %v3796_v36 }
 0x481   :  { %2222 = vmatpush.msk.msra.mxu1 %vm1664_vm12, %v2726_v22  ;;  %vm1689_vm12 = vcmp.eq.s32.totalorder %v1603_v16, %v3800_v7  ;;  %v1618_v35 = vadd.s32 536, %v3796_v36  ;;  %v1617_v40 = vadd.s32 528, %v3796_v36  ;;  %v1616_v53 = vadd.s32 520, %v3796_v36 }
 0x482   :  { %2259 = vmatpush.msk.msrb.mxu0 %vm1691_vm10, %v2726_v22  ;;  %vm1659_vm10 = vcmp.eq.s32.totalorder %v1573_v4, %v3800_v7  ;;  %2217 = vmatpush.msk.msra.mxu2 %vm1637_vm13, %v2726_v22  ;;  %vm1709_vm13 = vcmp.eq.s32.totalorder %v1623_v27, %v3800_v7  ;;  %v1636_v63 = vadd.s32 680, %v3796_v36  ;;  %v1615_v50 = vadd.s32 512, %v3796_v36 }
 0x483   :  { %2223 = vmatpush.msk.msra.mxu1 %vm1663_vm15, %v2726_v22  ;;  %vm1688_vm15 = vcmp.eq.s32.totalorder %v1602_v60, %v3800_v7  ;;  %v1635_v60 = vadd.s32 672, %v3796_v36  ;;  %v4225_v57 = vmov 0.0   ;;  %v1632_v31 = vadd.s32 648, %v3796_v36 }
 0x484   :  { %2260 = vmatpush.msk.msrb.mxu0 %vm1690_vm3, %v2726_v22  ;;  %vm1658_vm3 = vcmp.eq.s32.totalorder %v1572_v14, %v3800_v7  ;;  %2266 = vmatpush.msk.msrb.mxu2 %vm1716_vm9, %v2726_v22  ;;  %vm1705_vm9 = vcmp.eq.s32.totalorder %v1619_v29, %v3800_v7 }
 0x485   :  { %2224 = vmatpush.msk.msra.mxu1 %vm1662_vm1, %v2726_v22  ;;  %vm1687_vm1 = vcmp.eq.s32.totalorder %v1601_v45, %v3800_v7 }
 0x486   :  { %2261 = vmatpush.msk.msrb.mxu0 %vm1689_vm12, %v2726_v22  ;;  %vm1657_vm12 = vcmp.eq.s32.totalorder %v1571_v24, %v3800_v7  ;;  %2267 = vmatpush.msk.msrb.mxu2 %vm1715_vm0, %v2726_v22  ;;  %vm1703_vm0 = vcmp.eq.s32.totalorder %v1617_v40, %v3800_v7  ;;  %v1631_v24 = vadd.s32 640, %v3796_v36 }
 0x487   :  { %2225 = vmatpush.msk.msra.mxu1 %vm1661_vm6, %v2726_v22  ;;  %vm1686_vm6 = vcmp.eq.s32.totalorder %v1600_v30, %v3800_v7 }
 0x488   :  { %2262 = vmatpush.msk.msrb.mxu0 %vm1688_vm15, %v2726_v22  ;;  %vm1656_vm15 = vcmp.eq.s32.totalorder %v1570_v55, %v3800_v7  ;;  %2268 = vmatpush.msk.msrb.mxu2 %vm1714_vm2, %v2726_v22  ;;  %vm1722_vm2 = vcmp.eq.s32.totalorder %v1636_v63, %v3800_v7 }
 0x489   :  { %2226 = vmatpush.msk.msra.mxu1 %vm1660_vm7, %v2726_v22  ;;  %vm1669_vm7 = vcmp.eq.s32.totalorder %v1583_v17, %v3800_v7  ;;  %v2201_v4 = vsel %vm1722_vm2, 1.0, %v4225_v57 }
 0x48a   :  { %2263 = vmatpush.msk.msrb.mxu0 %vm1687_vm1, %v2726_v22  ;;  %2249 = vmatpush.msk.msra.mxu3 %vm1669_vm7, %v2726_v22  ;;  %vm1654_vm1 = vcmp.eq.s32.totalorder %v1568_v61, %v3800_v7  ;;  %vm1708_vm7 = vcmp.eq.s32.totalorder %v1622_v23, %v3800_v7 }
 0x48b   :  { %2227 = vmatpush.msk.msra.mxu1 %vm1659_vm10, %v2726_v22  ;;  %vm1655_vm10 = vcmp.eq.s32.totalorder %v1569_v0, %v3800_v7  ;;  %2269 = vmatpush.msk.msrb.mxu2 %vm1713_vm4, %v2726_v22  ;;  %vm1721_vm4 = vcmp.eq.s32.totalorder %v1635_v60, %v3800_v7 }
 0x48c   :  { %2264 = vmatpush.msk.msrb.mxu0 %vm1686_vm6, %v2726_v22  ;;  %vm1712_vm6 = vcmp.eq.s32.totalorder %v1626_v48, %v3800_v7 }
 0x48d   :  { %2228 = vmatpush.msk.msra.mxu1 %vm1658_vm3, %v2726_v22  ;;  %vm1653_vm3 = vcmp.eq.s32.totalorder %v1567_v6, %v3800_v7  ;;  %2270 = vmatpush.msk.msrb.mxu2 %vm1712_vm6, %v2726_v22  ;;  %vm1701_vm6 = vcmp.eq.s32.totalorder %v1615_v50, %v3800_v7 }
 0x48e   :  { %2265 = vmatpush.msk.msrb.mxu0 %vm1685_vm14, %v2726_v22  ;;  %vm1707_vm14 = vcmp.eq.s32.totalorder %v1621_v2, %v3800_v7 }
 0x48f   :  { %2229 = vmatpush.msk.msra.mxu1 %vm1657_vm12, %v2726_v22  ;;  %vm1710_vm12 = vcmp.eq.s32.totalorder %v1624_v12, %v3800_v7  ;;  %2271 = vmatpush.msk.msrb.mxu2 %vm1711_vm11, %v2726_v22 }
 0x491   :  { %2230 = vmatpush.msk.msra.mxu1 %vm1656_vm15, %v2726_v22  ;;  %2272 = vmatpush.msk.msrb.mxu2 %vm1710_vm12, %v2726_v22  ;;  %vm1706_vm15 = vcmp.eq.s32.totalorder %v1620_v58, %v3800_v7 }
 0x493   :  { %2231 = vmatpush.msk.msra.mxu1 %vm1655_vm10, %v2726_v22  ;;  %2273 = vmatpush.msk.msrb.mxu2 %vm1709_vm13, %v2726_v22  ;;  %vm1704_vm10 = vcmp.eq.s32.totalorder %v1618_v35, %v3800_v7  ;;  %vm1718_vm13 = vcmp.eq.s32.totalorder %v1632_v31, %v3800_v7 }
 0x495   :  { %2232 = vmatpush.msk.msra.mxu1 %vm1654_vm1, %v2726_v22  ;;  %2274 = vmatpush.msk.msrb.mxu2 %vm1708_vm7, %v2726_v22  ;;  %vm1905_vm1 = vcmask 1042432   ;;  %vm1717_vm7 = vcmp.eq.s32.totalorder %v1631_v24, %v3800_v7 }
 0x497   :  { %2233 = vmatpush.msk.msra.mxu1 %vm1653_vm3, %v2726_v22  ;;  %2275 = vmatpush.msk.msrb.mxu2 %vm1707_vm14, %v2726_v22  ;;  %vm1702_vm3 = vcmp.eq.s32.totalorder %v1616_v53, %v3800_v7  ;;  %vm1895_vm14 = vcmask 351232  }
 0x499   :  { %2276 = vmatpush.msk.msrb.mxu2 %vm1706_vm15, %v2726_v22  ;;  %2282 = vmatpush.msk.msrb.mxu1 %vm1905_vm1, %v2201_v4 }
 0x49b   :  { %2277 = vmatpush.msk.msrb.mxu2 %vm1705_vm9, %v2726_v22  ;;  %2283 = vmatpush.msk.msrb.mxu1 %vm1721_vm4, %v2726_v22 }
 0x49d   :  { %2278 = vmatpush.msk.msrb.mxu2 %vm1704_vm10, %v2726_v22  ;;  %vm2076_vm10 = vcmask 584704  }
 0x49f   :  { %2279 = vmatpush.msk.msrb.mxu2 %vm1703_vm0, %v2726_v22 }
 0x4a1   :  { %2280 = vmatpush.msk.msrb.mxu2 %vm1702_vm3, %v2726_v22 }
 0x4a3   :  { %2281 = vmatpush.msk.msrb.mxu2 %vm1701_vm6, %v2726_v22 }
 0x4b4   :  { %v4085_v28 = vpop.permute.xlu2 %2683 }
 0x4b5   :  { %v2685_v56 = vunpack.i.l.bf16 %v4085_v28  ;;  %v2686_v0 = vunpack.i.h.bf16 %v4085_v28 }
 0x4bc   :  { %v2689_v14 = vpop.permute.xlu0 %2688 }
 0x4bd   :  { %v2691_v55 = vunpack.i.h.bf16 %v2689_v14  ;;  %v2690_v32 = vunpack.i.l.bf16 %v2689_v14 }
 0x4c4   :  { %v4099_v5 = vpop.permute.xlu2 %2698 }
 0x4c5   :  { %v2701_v20 = vunpack.i.h.bf16 %v4099_v5  ;;  %v2700_v38 = vunpack.i.l.bf16 %v4099_v5  ;;  %v1449_v46 = vpop.permute.xlu0 %1448 }
 0x4c7   :  { %v1476_v52 = vsel %vm96_vm5, %v2685_v56, %v2700_v38  ;;  %v1477_v16 = vsel %vm96_vm5, %v2700_v38, %v2701_v20 }
 0x4c8   :  { %v1509_v62 = vmax.f32 %v3780_v18, %v1476_v52  ;;  %v1510_v44 = vmax.f32 %v3848_v49, %v1477_v16  ;;  %v1634_v18 = vadd.s32 664, %v3796_v36  ;;  %v1633_v49 = vadd.s32 656, %v3796_v36 }
 0x4c9   :  { %v1479_v36 = vsel %vm96_vm5, %v2686_v0, %v2690_v32 }
 0x4ca   :  { %1977 = vmatmul.f32.vlgmr.msra.gmra.mxu3 %v1509_v62  ;;  %2003 = vmatmul.f32.vlgmr.msrb.gmra.mxu0 %v1510_v44  ;;  %vm1720_vm11 = vcmp.eq.s32.totalorder %v1634_v18, %v3800_v7  ;;  %vm1719_vm12 = vcmp.eq.s32.totalorder %v1633_v49, %v3800_v7 }
 0x4cb   :  { %2284 = vmatpush.msk.msrb.mxu1 %vm1720_vm11, %v2726_v22 }
 0x4cc   :  { %v2679_v43 = vpop.permute.xlu1 %2678 }
 0x4cd   :  { %v2681_v45 = vunpack.i.h.bf16 %v2679_v43  ;;  %v2680_v54 = vunpack.i.l.bf16 %v2679_v43  ;;  %2285 = vmatpush.msk.msrb.mxu1 %vm1719_vm12, %v2726_v22 }
 0x4cf   :  { %v1475_v13 = vsel %vm96_vm5, %v2681_v45, %v2685_v56  ;;  %v1474_v30 = vsel %vm96_vm5, %v2680_v54, %v2681_v45  ;;  %2286 = vmatpush.msk.msrb.mxu1 %vm1718_vm13, %v2726_v22 }
 0x4d0   :  { %v1508_v17 = vmax.f32 %v3789_v34, %v1475_v13  ;;  %v1507_v10 = vmax.f32 %v3786_v26, %v1474_v30  ;;  %v1480_v34 = vsel %vm96_vm5, %v2690_v32, %v2691_v55  ;;  %v1513_v26 = vmax.f32 %v3783_v59, %v1479_v36  ;;  %v2709_v48 = vpop.permute.xlu2 %2708 }
 0x4d1   :  { %2287 = vmatpush.msk.msrb.mxu1 %vm1717_vm7, %v2726_v22  ;;  %v1514_v1 = vmax.f32 %v3755_v33, %v1480_v34  ;;  %v2710_v27 = vunpack.i.l.bf16 %v2709_v48  ;;  %v1478_v33 = vsel %vm96_vm5, %v2701_v20, %v1449_v46  ;;  %v2711_v56 = vunpack.i.h.bf16 %v2709_v48 }
 0x4d2   :  { %1925 = vmatmul.f32.vlgmr.msra.gmra.mxu2 %v1507_v10  ;;  %1951 = vmatmul.f32.vlgmr.msra.gmra.mxu1 %v1508_v17  ;;  %v1511_v35 = vmax.f32 %v3851_v39, %v1478_v33 }
 0x4d8   :  { %v1473_v63 = vpop.permute.xlu2 %1472 }
 0x4da   :  { %1928 = vmatmul.f32.gmra.mxu2 %v1513_v26  ;;  %1954 = vmatmul.f32.gmra.mxu1 %v1514_v1 }
 0x4dc   :  { %v2694_v61 = vpop.permute.xlu1 %2693 }
 0x4dd   :  { %v2696_v47 = vunpack.i.h.bf16 %v2694_v61  ;;  %v2695_v6 = vunpack.i.l.bf16 %v2694_v61 }
 0x4df   :  { %v1484_v7 = vsel %vm96_vm5, %v2695_v6, %v2696_v47 }
 0x4e0   :  { %v1519_v9 = vmax.f32 %v3804_v51, %v1484_v7 }
 0x4e2   :  { %1931 = vmatmul.f32.gmra.mxu2 %v1519_v9 }
 0x4e4   :  { %v2704_v12 = vpop.permute.xlu1 %2703 }
 0x4e5   :  { %v2706_v23 = vunpack.i.h.bf16 %v2704_v12  ;;  %v2705_v22 = vunpack.i.l.bf16 %v2704_v12  ;;  %v1461_v5 = vpop.permute.xlu0 %1460 }
 0x4e6   :  { %v1483_v38 = vsel %vm96_vm5, %v2710_v27, %v1461_v5  ;;  %v1518_v16 = vmax.f32 %v3894_v3, %v1461_v5 }
 0x4e7   :  { %v1485_v59 = vsel %vm96_vm5, %v2696_v47, %v2705_v22  ;;  %v1481_v28 = vsel %vm96_vm5, %v2691_v55, %v2706_v23  ;;  %v1482_v2 = vsel %vm96_vm5, %v2706_v23, %v2710_v27  ;;  %v1486_v20 = vsel %vm96_vm5, %v2705_v22, %v2711_v56 }
 0x4e8   :  { %v1520_v58 = vmax.f32 %v3854_v25, %v1485_v59  ;;  %v1515_v51 = vmax.f32 %v3758_v15, %v1481_v28  ;;  %v1516_v29 = vmax.f32 %v3884_v8, %v1482_v2  ;;  %v1512_v15 = vmax.f32 %v3767_v41, %v1449_v46 }
 0x4e9   :  { %v1521_v25 = vmax.f32 %v3887_v11, %v1486_v20  ;;  %v1517_v8 = vmax.f32 %v3897_v37, %v1483_v38  ;;  %v1524_v41 = vmax.f32 %v3913_v42, %v1473_v63 }
 0x4ea   :  { %1957 = vmatmul.f32.gmra.mxu1 %v1520_v58  ;;  %1980 = vmatmul.f32.gmra.mxu3 %v1515_v51 }
 0x4eb   :  { %2006 = vmatmul.f32.gmra.mxu0 %v1516_v29  ;;  %2029 = vmatmul.f32.vlgmr.msrb.gmra.mxu2 %v1511_v35 }
 0x4ee   :  { %v1471_v40 = vpop.permute.xlu1 %1470 }
 0x4ef   :  { %v1487_v53 = vsel %vm96_vm5, %v2711_v56, %v1471_v40  ;;  %v1488_v52 = vsel %vm96_vm5, %v1471_v40, %v1473_v63 }
 0x4f0   :  { %v1522_v39 = vmax.f32 %v3901_v21, %v1487_v53  ;;  %v1523_v62 = vmax.f32 %v3910_v19, %v1488_v52 }
 0x4f2   :  { %1983 = vmatmul.f32.gmra.mxu3 %v1521_v25  ;;  %2288 = vmatmul.msk.f32.vlgmr.msrb.gmra.mxu1 %vm1895_vm14, %v1512_v15 }
 0x4f3   :  { %2009 = vmatmul.f32.gmra.mxu0 %v1522_v39  ;;  %2032 = vmatmul.f32.gmra.mxu2 %v1517_v8 }
 0x4fa   :  { %2289 = vmatmul.msk.f32.gmra.mxu1 %vm1895_vm14, %v1518_v16 }
 0x4fb   :  { %2035 = vmatmul.f32.gmra.mxu2 %v1523_v62 }
 0x502   :  { %2290 = vmatmul.msk.f32.gmra.mxu1 %vm1895_vm14, %v1524_v41 }
 0x547   :  { %v2004_v49 = vpop.f32.mrf.mxu0 }
 0x54d   :  { %v1978_v50 = vpop.f32.mrf.mxu3 }
 0x54f   :  { %v1952_v11 = vpop.f32.mrf.mxu1 }
 0x555   :  { %v1926_v37 = vpop.f32.mrf.mxu2 }
 0x556   :  { %v1953_v60 = vadd.f32 %v1952_v11, %v1926_v37 }
 0x557   :  { %v1955_v44 = vpop.f32.mrf.mxu1 }
 0x558   :  { %v1979_v18 = vadd.f32 %v1978_v50, %v1953_v60 }
 0x55a   :  { %v2005_v43 = vadd.f32 %v2004_v49, %v1979_v18 }
 0x55d   :  { %v1929_v21 = vpop.f32.mrf.mxu2 }
 0x55e   :  { %v1956_v45 = vadd.f32 %v1955_v44, %v1929_v21 }
 0x565   :  { %v1932_v57 = vpop.f32.mrf.mxu2 }
 0x567   :  { %v1958_v4 = vpop.f32.mrf.mxu1 }
 0x568   :  { %v2007_v30 = vpop.f32.mrf.mxu0  ;;  %v1959_v32 = vadd.f32 %v1958_v4, %v1932_v57 }
 0x56d   :  { %v1981_v3 = vpop.f32.mrf.mxu3 }
 0x56e   :  { %v2030_v19 = vpop.f32.mrf.mxu2  ;;  %v1982_v13 = vadd.f32 %v1981_v3, %v1956_v45 }
 0x56f   :  { %v2031_v54 = vadd.f32 %v2030_v19, %v2005_v43  ;;  %v2056_v14 = vpop.f32.mrf.mxu1 }
 0x570   :  { %v2008_v17 = vadd.f32 %v2007_v30, %v1982_v13  ;;  %v2010_v61 = vpop.f32.mrf.mxu0 }
 0x571   :  { %v2057_v42 = vadd.f32 %v2056_v14, %v2031_v54 }
 0x573   :  { %vm2065_vm5 = vcmp.gt.f32.partialorder %v2057_v42, 0.0  ;;  %v2068_v31 = vmul.f32 0.1, %v2057_v42 }
 0x575   :  { %v2071_v24 = vsel %vm2065_vm5, %v2057_v42, %v2068_v31  ;;  %v1984_v10 = vpop.f32.mrf.mxu3 }
 0x576   :  { %2074 = vst.msk [vmem:[%s4194_s6] sm:$0xff] %vm240_vm8, %v2071_v24  ;;  %v2033_v55 = vpop.f32.mrf.mxu2  ;;  %v1985_v34 = vadd.f32 %v1984_v10, %v1959_v32 }
 0x577   :  { %v2034_v0 = vadd.f32 %v2033_v55, %v2008_v17  ;;  %v2059_v36 = vpop.f32.mrf.mxu1 }
 0x578   :  { %v2011_v6 = vadd.f32 %v2010_v61, %v1985_v34 }
 0x579   :  { %v2060_v26 = vadd.f32 %v2059_v36, %v2034_v0 }
 0x57b   :  { %vm2066_vm15 = vcmp.gt.f32.partialorder %v2060_v26, 0.0  ;;  %v2069_v1 = vmul.f32 0.1, %v2060_v26 }
 0x57d   :  { %v2072_v47 = vsel %vm2066_vm15, %v2060_v26, %v2069_v1 }
 0x57e   :  { %2075 = vst.msk [vmem:[%s4194_s6 + $0x8] sm:$0xff] %vm240_vm8, %v2072_v47  ;;  %v2036_v7 = vpop.f32.mrf.mxu2 }
 0x57f   :  { %v2037_v9 = vadd.f32 %v2036_v7, %v2011_v6  ;;  %v2062_v48 = vpop.f32.mrf.mxu1 }
 0x581   :  { %v2063_v46 = vadd.f32 %v2062_v48, %v2037_v9 }
 0x583   :  { %vm2067_vm9 = vcmp.gt.f32.partialorder %v2063_v46, 0.0  ;;  %v2070_v12 = vmul.f32 0.1, %v2063_v46 }
 0x585   :  { %v2073_v27 = vsel %vm2067_vm9, %v2063_v46, %v2070_v12 }
 0x586   :  { %2077 = vst.msk [vmem:[%s4194_s6 + $0x10] sm:$0xf] %vm2076_vm10, %v2073_v27 }

</bundles_post_ra>
